<compile_context>
chip_gen: v7x
topology: tpu7x:2x2x1
jax: 0.10.0
libtpu: 0.0.40
codegen_flags: <defaults>
</compile_context>

<pallas_src>
import functools

import jax
import jax.numpy as jnp
from jax.experimental import pallas as pl
from jax.experimental.pallas import tpu as pltpu


# ----------------------------- fused LSTM + head kernel -----------------------------
def make_fused_kernel(no_layers, T, B, H):
    """Builds a kernel for fixed (no_layers, T, padded B, H).

    Ref order:
      inputs : x_flat (T*B, E), h0 (L, B, H), c0 (L, B, H),
               [w_ihT_l (D_l, 4H), w_hhT_l (H, 4H), b_l (1, 4H)] * L,
               fc_w (1, H), fc_b (1, 1)
      outputs: sig (1, B), hN (L, B, H), cN (L, B, H)
      scratch: seq_sc (T*B, H), xg_sc (T*B, 4H)
    """

    def kernel(*refs):
        x_ref, h0_ref, c0_ref = refs[0:3]
        w_refs = refs[3:3 + 3 * no_layers]
        fcw_ref = refs[3 + 3 * no_layers]
        fcb_ref = refs[4 + 3 * no_layers]
        sig_ref, hN_ref, cN_ref = refs[5 + 3 * no_layers:8 + 3 * no_layers]
        seq_sc, xg_sc = refs[8 + 3 * no_layers:]

        h_fin = None
        for l in range(no_layers):
            w_ihT = w_refs[3 * l][...]       # (D_in, 4H)  pre-transposed
            w_hhT = w_refs[3 * l + 1][...]   # (H, 4H)     pre-transposed
            b = w_refs[3 * l + 2][...]       # (1, 4H)

            # ---- hoisted input projection: one big MXU matmul over all T*B rows ----
            x_flat = x_ref[...] if l == 0 else seq_sc[...]
            xg_sc[...] = (jnp.dot(x_flat, w_ihT,
                                  preferred_element_type=jnp.float32) + b)

            # ---- sequential recurrence: only h @ W_hh^T per step ----
            def step(t, carry):
                h, c = carry
                row = pl.multiple_of(t * B, B)
                gates = (xg_sc[pl.ds(row, B), :]
                         + jnp.dot(h, w_hhT, preferred_element_type=jnp.float32))
                i_g = jax.nn.sigmoid(gates[:, 0 * H:1 * H])
                f_g = jax.nn.sigmoid(gates[:, 1 * H:2 * H])
                g_g = jnp.tanh(gates[:, 2 * H:3 * H])
                o_g = jax.nn.sigmoid(gates[:, 3 * H:4 * H])
                c_new = f_g * c + i_g * g_g
                h_new = o_g * jnp.tanh(c_new)
                # inter-layer activation stays in VMEM (never touches HBM)
                seq_sc[pl.ds(row, B), :] = h_new
                return h_new, c_new

            h_fin, c_fin = jax.lax.fori_loop(
                0, T, step,
                (h0_ref[l].astype(jnp.float32), c0_ref[l].astype(jnp.float32)),
                unroll=True)

            # written exactly once per layer
            hN_ref[l] = h_fin.astype(hN_ref.dtype)
            cN_ref[l] = c_fin.astype(cN_ref.dtype)

        # ---- fused fc + sigmoid head on the final hidden of the last layer ----
        # fc_w (1,H) x h_fin (B,H), contracting H -> lane-dense (1, B) output.
        logit = jax.lax.dot_general(
            fcw_ref[...], h_fin,
            dimension_numbers=(((1,), (1,)), ((), ())),
            preferred_element_type=jnp.float32) + fcb_ref[...]
        sig_ref[...] = jax.nn.sigmoid(logit).astype(sig_ref.dtype)

    return kernel


# ------------------------------- full forward ---------------------------------
def sentiment_rnn_forward(params, x_ids, hidden, no_layers, hidden_dim):
    """Mirrors SentimentRNN.forward (drop_prob=0.0 -> dropout is identity).

    x_ids: (B, T) int32; hidden: (h0, c0), each (no_layers, B, H).
    Returns (sig_out (B,), (h_n, c_n)).
    """
    h0_all, c0_all = hidden
    B, T = x_ids.shape
    H = hidden_dim
    E = params["embedding"].shape[1]

    # Pad batch to a multiple of 8 sublanes (padded rows are discarded at the end).
    B_pad = ((B + 7) // 8) * 8
    pad = B_pad - B
    if pad:
        x_ids_p = jnp.pad(x_ids, ((0, pad), (0, 0)))
        h0_p = jnp.pad(h0_all, ((0, 0), (0, pad), (0, 0)))
        c0_p = jnp.pad(c0_all, ((0, 0), (0, pad), (0, 0)))
    else:
        x_ids_p, h0_p, c0_p = x_ids, h0_all, c0_all

    # Embedding gather directly in time-major, flattened to (T*B_pad, E).
    # (Data-dependent gather kept as plain-JAX glue outside the kernel.)
    embeds = jnp.take(params["embedding"], x_ids_p.T, axis=0).reshape(T * B_pad, E)

    # Pre-transpose weights once (one-time layout change outside the recurrence).
    weight_args = []
    for l in range(no_layers):
        weight_args += [params[f"w_ih_{l}"].T,    # (D_in, 4H)
                        params[f"w_hh_{l}"].T,    # (H, 4H)
                        params[f"b_{l}"]]         # (1, 4H)

    kernel = make_fused_kernel(no_layers, T, B_pad, H)
    sig_row, h_n_p, c_n_p = pl.pallas_call(
        kernel,
        out_shape=(
            jax.ShapeDtypeStruct((1, B_pad), jnp.float32),              # sigmoid row
            jax.ShapeDtypeStruct((no_layers, B_pad, H), jnp.float32),   # h_n
            jax.ShapeDtypeStruct((no_layers, B_pad, H), jnp.float32),   # c_n
        ),
        scratch_shapes=[
            pltpu.VMEM((T * B_pad, H), jnp.float32),       # inter-layer activations
            pltpu.VMEM((T * B_pad, 4 * H), jnp.float32),   # hoisted gate pre-activations
        ],
    )(embeds, h0_p, c0_p, *weight_args, params["fc_w"], params["fc_b"])

    sig_out = sig_row[0, :B]                               # (B,)
    new_hidden = (h_n_p[:, :B], c_n_p[:, :B])
    return sig_out, new_hidden


# --------------------------- pure-JAX reference (for checking) ------------------
def reference_forward(params, x_ids, hidden, no_layers, hidden_dim):
    h0_all, c0_all = hidden
    B, T = x_ids.shape
    H = hidden_dim
    embeds = jnp.take(params["embedding"], x_ids, axis=0)   # (B, T, E)
    layer_in = embeds
    h_fin, c_fin = [], []
    for l in range(no_layers):
        w_ih, w_hh, b = params[f"w_ih_{l}"], params[f"w_hh_{l}"], params[f"b_{l}"][0]
        h, c = h0_all[l], c0_all[l]
        outs = []
        for t in range(T):
            g = layer_in[:, t, :] @ w_ih.T + h @ w_hh.T + b
            i = jax.nn.sigmoid(g[:, :H])
            f = jax.nn.sigmoid(g[:, H:2 * H])
            gg = jnp.tanh(g[:, 2 * H:3 * H])
            o = jax.nn.sigmoid(g[:, 3 * H:])
            c = f * c + i * gg
            h = o * jnp.tanh(c)
            outs.append(h)
        layer_in = jnp.stack(outs, axis=1)
        h_fin.append(h)
        c_fin.append(c)
    logits = layer_in.reshape(-1, H) @ params["fc_w"].T + params["fc_b"][0]
    sig = jax.nn.sigmoid(logits).reshape(B, -1)[:, -1]
    return sig, (jnp.stack(h_fin), jnp.stack(c_fin))


# ------------------------------- parameter init --------------------------------
def init_params(key, no_layers, vocab_size, hidden_dim, embedding_dim):
    params = {}
    k = 1.0 / jnp.sqrt(jnp.float32(hidden_dim))
    keys = jax.random.split(key, 2 + 4 * no_layers)
    ki = 0

    params["embedding"] = jax.random.normal(
        keys[ki], (vocab_size, embedding_dim), jnp.float32); ki += 1

    for l in range(no_layers):
        d_in = embedding_dim if l == 0 else hidden_dim
        params[f"w_ih_{l}"] = jax.random.uniform(
            keys[ki], (4 * hidden_dim, d_in), jnp.float32, -k, k); ki += 1
        params[f"w_hh_{l}"] = jax.random.uniform(
            keys[ki], (4 * hidden_dim, hidden_dim), jnp.float32, -k, k); ki += 1
        b_ih = jax.random.uniform(
            keys[ki], (4 * hidden_dim,), jnp.float32, -k, k); ki += 1
        b_hh = jax.random.uniform(
            keys[ki], (4 * hidden_dim,), jnp.float32, -k, k); ki += 1
        params[f"b_{l}"] = (b_ih + b_hh).reshape(1, 4 * hidden_dim)

    kf = jax.random.split(keys[-1], 2)
    params["fc_w"] = jax.random.uniform(kf[0], (1, hidden_dim), jnp.float32, -k, k)
    params["fc_b"] = jax.random.uniform(kf[1], (1, 1), jnp.float32, -k, k)
    return params


# ------------------------------------ main --------------------------------------
if __name__ == "__main__":
    no_layers = 2
    vocab_size = 32
    hidden_dim = 32
    embedding_dim = 16
    B, T = 2, 8

    key = jax.random.PRNGKey(0)
    k_param, k_ids = jax.random.split(key)

    params = init_params(k_param, no_layers, vocab_size, hidden_dim, embedding_dim)
    x_ids = jax.random.randint(k_ids, (B, T), 0, vocab_size, dtype=jnp.int32)

    # init_hidden(batch_size): zeros
    h0 = jnp.zeros((no_layers, B, hidden_dim), jnp.float32)
    c0 = jnp.zeros((no_layers, B, hidden_dim), jnp.float32)

    fwd = jax.jit(functools.partial(sentiment_rnn_forward,
                                    no_layers=no_layers, hidden_dim=hidden_dim))
    sig_out, (h_n, c_n) = fwd(params, x_ids, (h0, c0))
    jax.block_until_ready((sig_out, h_n, c_n))

    assert sig_out.shape == (B,)
    assert h_n.shape == (no_layers, B, hidden_dim)
    assert c_n.shape == (no_layers, B, hidden_dim)

    # Correctness against a pure-JAX reference of the PyTorch forward.
    sig_ref, (h_ref, c_ref) = reference_forward(
        params, x_ids, (h0, c0), no_layers, hidden_dim)
    assert bool(jnp.allclose(sig_out, sig_ref, rtol=1e-5, atol=1e-5))
    assert bool(jnp.allclose(h_n, h_ref, rtol=1e-5, atol=1e-5))
    assert bool(jnp.allclose(c_n, c_ref, rtol=1e-5, atol=1e-5))

    print("KERNEL_OK")
</pallas_src>

<mosaic_0001>
module attributes {stable_mosaic.version = 11 : i64} {
  func.func @kernel(%arg0: memref<64x16xf32, #tpu.memory_space<vmem>>, %arg1: memref<2x8x32xf32, #tpu.memory_space<vmem>>, %arg2: memref<2x8x32xf32, #tpu.memory_space<vmem>>, %arg3: memref<16x128xf32, #tpu.memory_space<vmem>>, %arg4: memref<32x128xf32, #tpu.memory_space<vmem>>, %arg5: memref<1x128xf32, #tpu.memory_space<vmem>>, %arg6: memref<32x128xf32, #tpu.memory_space<vmem>>, %arg7: memref<32x128xf32, #tpu.memory_space<vmem>>, %arg8: memref<1x128xf32, #tpu.memory_space<vmem>>, %arg9: memref<1x32xf32, #tpu.memory_space<vmem>>, %arg10: memref<1x1xf32, #tpu.memory_space<vmem>>, %arg11: memref<1x8xf32, #tpu.memory_space<vmem>>, %arg12: memref<2x8x32xf32, #tpu.memory_space<vmem>>, %arg13: memref<2x8x32xf32, #tpu.memory_space<vmem>>, %arg14: memref<64x32xf32, #tpu.memory_space<vmem>>, %arg15: memref<64x128xf32, #tpu.memory_space<vmem>>) attributes {dimension_semantics = [], scalar_prefetch = 0 : i64, scratch_operands = 2 : i64, tpu.core_type = #tpu.core_type<tc>} {
    %c0 = arith.constant 0 : index
    %c0_0 = arith.constant 0 : index
    %0 = vector.load %arg3[%c0, %c0_0] : memref<16x128xf32, #tpu.memory_space<vmem>>, vector<16x128xf32>
    %c0_1 = arith.constant 0 : index
    %c0_2 = arith.constant 0 : index
    %1 = vector.load %arg4[%c0_1, %c0_2] : memref<32x128xf32, #tpu.memory_space<vmem>>, vector<32x128xf32>
    %c0_3 = arith.constant 0 : index
    %c0_4 = arith.constant 0 : index
    %2 = vector.load %arg5[%c0_3, %c0_4] : memref<1x128xf32, #tpu.memory_space<vmem>>, vector<1x128xf32>
    %c0_5 = arith.constant 0 : index
    %c0_6 = arith.constant 0 : index
    %3 = vector.load %arg0[%c0_5, %c0_6] : memref<64x16xf32, #tpu.memory_space<vmem>>, vector<64x16xf32>
    %cst = arith.constant dense<0.000000e+00> : vector<64x128xf32>
    %4 = tpu.matmul %3, %0, %cst {dimension_numbers = #tpu.dot_dimension_numbers<[1], [0], [0], [1], [0, 0, 1, 1], [], []>} : vector<64x16xf32>, vector<16x128xf32>, vector<64x128xf32> -> vector<64x128xf32>
    %5 = vector.broadcast %2 : vector<1x128xf32> to vector<64x128xf32>
    %6 = arith.addf %4, %5 : vector<64x128xf32>
    %c0_7 = arith.constant 0 : index
    %c0_8 = arith.constant 0 : index
    %7 = vector.load %arg15[%c0_7, %c0_8] : memref<64x128xf32, #tpu.memory_space<vmem>>, vector<64x128xf32>
    tpu.vector_store %arg15[%c0_7, %c0_8], %6 {strides = array<i32>} : memref<64x128xf32, #tpu.memory_space<vmem>>, vector<64x128xf32>,
    %c0_9 = arith.constant 0 : index
    %c0_10 = arith.constant 0 : index
    %c0_11 = arith.constant 0 : index
    %8 = vector.load %arg1[%c0_9, %c0_10, %c0_11] : memref<2x8x32xf32, #tpu.memory_space<vmem>>, vector<1x8x32xf32>
    %9 = vector.shape_cast %8 : vector<1x8x32xf32> to vector<8x32xf32>
    %c0_12 = arith.constant 0 : index
    %c0_13 = arith.constant 0 : index
    %c0_14 = arith.constant 0 : index
    %10 = vector.load %arg2[%c0_12, %c0_13, %c0_14] : memref<2x8x32xf32, #tpu.memory_space<vmem>>, vector<1x8x32xf32>
    %11 = vector.shape_cast %10 : vector<1x8x32xf32> to vector<8x32xf32>
    %c0_i32 = arith.constant 0 : i32
    %c8_i32 = arith.constant 8 : i32
    %12 = arith.muli %c0_i32, %c8_i32 : i32
    %13 = tpu.assume_multiple %12, 8 : i32
    %14 = arith.index_cast %13 : i32 to index
    %c0_15 = arith.constant 0 : index
    %15 = vector.load %arg15[%14, %c0_15] : memref<64x128xf32, #tpu.memory_space<vmem>>, vector<8x128xf32>
    %cst_16 = arith.constant dense<0.000000e+00> : vector<8x128xf32>
    %16 = tpu.matmul %9, %1, %cst_16 {dimension_numbers = #tpu.dot_dimension_numbers<[1], [0], [0], [1], [0, 0, 1, 1], [], []>} : vector<8x32xf32>, vector<32x128xf32>, vector<8x128xf32> -> vector<8x128xf32>
    %17 = arith.addf %15, %16 : vector<8x128xf32>
    %18 = vector.extract_strided_slice %17 {offsets = [0, 0], sizes = [8, 32], strides = [1, 1]} : vector<8x128xf32> to vector<8x32xf32>
    %19 = arith.negf %18 : vector<8x32xf32>
    %20 = math.exp %19 : vector<8x32xf32>
    %cst_17 = arith.constant 1.000000e+00 : f32
    %21 = vector.broadcast %cst_17 : f32 to vector<8x32xf32>
    %22 = arith.addf %21, %20 : vector<8x32xf32>
    %23 = arith.divf %21, %22 : vector<8x32xf32>
    %24 = vector.extract_strided_slice %17 {offsets = [0, 32], sizes = [8, 32], strides = [1, 1]} : vector<8x128xf32> to vector<8x32xf32>
    %25 = arith.negf %24 : vector<8x32xf32>
    %26 = math.exp %25 : vector<8x32xf32>
    %cst_18 = arith.constant 1.000000e+00 : f32
    %27 = vector.broadcast %cst_18 : f32 to vector<8x32xf32>
    %28 = arith.addf %27, %26 : vector<8x32xf32>
    %29 = arith.divf %27, %28 : vector<8x32xf32>
    %30 = vector.extract_strided_slice %17 {offsets = [0, 64], sizes = [8, 32], strides = [1, 1]} : vector<8x128xf32> to vector<8x32xf32>
    %31 = math.tanh %30 : vector<8x32xf32>
    %32 = vector.extract_strided_slice %17 {offsets = [0, 96], sizes = [8, 32], strides = [1, 1]} : vector<8x128xf32> to vector<8x32xf32>
    %33 = arith.negf %32 : vector<8x32xf32>
    %34 = math.exp %33 : vector<8x32xf32>
    %cst_19 = arith.constant 1.000000e+00 : f32
    %35 = vector.broadcast %cst_19 : f32 to vector<8x32xf32>
    %36 = arith.addf %35, %34 : vector<8x32xf32>
    %37 = arith.divf %35, %36 : vector<8x32xf32>
    %38 = arith.mulf %29, %11 : vector<8x32xf32>
    %39 = arith.mulf %23, %31 : vector<8x32xf32>
    %40 = arith.addf %38, %39 : vector<8x32xf32>
    %41 = math.tanh %40 : vector<8x32xf32>
    %42 = arith.mulf %37, %41 : vector<8x32xf32>
    %43 = arith.index_cast %13 : i32 to index
    %c0_20 = arith.constant 0 : index
    %44 = vector.load %arg14[%43, %c0_20] : memref<64x32xf32, #tpu.memory_space<vmem>>, vector<8x32xf32>
    tpu.vector_store %arg14[%43, %c0_20], %42 {strides = array<i32>} : memref<64x32xf32, #tpu.memory_space<vmem>>, vector<8x32xf32>,
    %c1_i32 = arith.constant 1 : i32
    %c8_i32_21 = arith.constant 8 : i32
    %45 = arith.muli %c1_i32, %c8_i32_21 : i32
    %46 = tpu.assume_multiple %45, 8 : i32
    %47 = arith.index_cast %46 : i32 to index
    %c0_22 = arith.constant 0 : index
    %48 = vector.load %arg15[%47, %c0_22] : memref<64x128xf32, #tpu.memory_space<vmem>>, vector<8x128xf32>
    %cst_23 = arith.constant dense<0.000000e+00> : vector<8x128xf32>
    %49 = tpu.matmul %42, %1, %cst_23 {dimension_numbers = #tpu.dot_dimension_numbers<[1], [0], [0], [1], [0, 0, 1, 1], [], []>} : vector<8x32xf32>, vector<32x128xf32>, vector<8x128xf32> -> vector<8x128xf32>
    %50 = arith.addf %48, %49 : vector<8x128xf32>
    %51 = vector.extract_strided_slice %50 {offsets = [0, 0], sizes = [8, 32], strides = [1, 1]} : vector<8x128xf32> to vector<8x32xf32>
    %52 = arith.negf %51 : vector<8x32xf32>
    %53 = math.exp %52 : vector<8x32xf32>
    %cst_24 = arith.constant 1.000000e+00 : f32
    %54 = vector.broadcast %cst_24 : f32 to vector<8x32xf32>
    %55 = arith.addf %54, %53 : vector<8x32xf32>
    %56 = arith.divf %54, %55 : vector<8x32xf32>
    %57 = vector.extract_strided_slice %50 {offsets = [0, 32], sizes = [8, 32], strides = [1, 1]} : vector<8x128xf32> to vector<8x32xf32>
    %58 = arith.negf %57 : vector<8x32xf32>
    %59 = math.exp %58 : vector<8x32xf32>
    %cst_25 = arith.constant 1.000000e+00 : f32
    %60 = vector.broadcast %cst_25 : f32 to vector<8x32xf32>
    %61 = arith.addf %60, %59 : vector<8x32xf32>
    %62 = arith.divf %60, %61 : vector<8x32xf32>
    %63 = vector.extract_strided_slice %50 {offsets = [0, 64], sizes = [8, 32], strides = [1, 1]} : vector<8x128xf32> to vector<8x32xf32>
    %64 = math.tanh %63 : vector<8x32xf32>
    %65 = vector.extract_strided_slice %50 {offsets = [0, 96], sizes = [8, 32], strides = [1, 1]} : vector<8x128xf32> to vector<8x32xf32>
    %66 = arith.negf %65 : vector<8x32xf32>
    %67 = math.exp %66 : vector<8x32xf32>
    %cst_26 = arith.constant 1.000000e+00 : f32
    %68 = vector.broadcast %cst_26 : f32 to vector<8x32xf32>
    %69 = arith.addf %68, %67 : vector<8x32xf32>
    %70 = arith.divf %68, %69 : vector<8x32xf32>
    %71 = arith.mulf %62, %40 : vector<8x32xf32>
    %72 = arith.mulf %56, %64 : vector<8x32xf32>
    %73 = arith.addf %71, %72 : vector<8x32xf32>
    %74 = math.tanh %73 : vector<8x32xf32>
    %75 = arith.mulf %70, %74 : vector<8x32xf32>
    %76 = arith.index_cast %46 : i32 to index
    %c0_27 = arith.constant 0 : index
    %77 = vector.load %arg14[%76, %c0_27] : memref<64x32xf32, #tpu.memory_space<vmem>>, vector<8x32xf32>
    tpu.vector_store %arg14[%76, %c0_27], %75 {strides = array<i32>} : memref<64x32xf32, #tpu.memory_space<vmem>>, vector<8x32xf32>,
    %c2_i32 = arith.constant 2 : i32
    %c8_i32_28 = arith.constant 8 : i32
    %78 = arith.muli %c2_i32, %c8_i32_28 : i32
    %79 = tpu.assume_multiple %78, 8 : i32
    %80 = arith.index_cast %79 : i32 to index
    %c0_29 = arith.constant 0 : index
    %81 = vector.load %arg15[%80, %c0_29] : memref<64x128xf32, #tpu.memory_space<vmem>>, vector<8x128xf32>
    %cst_30 = arith.constant dense<0.000000e+00> : vector<8x128xf32>
    %82 = tpu.matmul %75, %1, %cst_30 {dimension_numbers = #tpu.dot_dimension_numbers<[1], [0], [0], [1], [0, 0, 1, 1], [], []>} : vector<8x32xf32>, vector<32x128xf32>, vector<8x128xf32> -> vector<8x128xf32>
    %83 = arith.addf %81, %82 : vector<8x128xf32>
    %84 = vector.extract_strided_slice %83 {offsets = [0, 0], sizes = [8, 32], strides = [1, 1]} : vector<8x128xf32> to vector<8x32xf32>
    %85 = arith.negf %84 : vector<8x32xf32>
    %86 = math.exp %85 : vector<8x32xf32>
    %cst_31 = arith.constant 1.000000e+00 : f32
    %87 = vector.broadcast %cst_31 : f32 to vector<8x32xf32>
    %88 = arith.addf %87, %86 : vector<8x32xf32>
    %89 = arith.divf %87, %88 : vector<8x32xf32>
    %90 = vector.extract_strided_slice %83 {offsets = [0, 32], sizes = [8, 32], strides = [1, 1]} : vector<8x128xf32> to vector<8x32xf32>
    %91 = arith.negf %90 : vector<8x32xf32>
    %92 = math.exp %91 : vector<8x32xf32>
    %cst_32 = arith.constant 1.000000e+00 : f32
    %93 = vector.broadcast %cst_32 : f32 to vector<8x32xf32>
    %94 = arith.addf %93, %92 : vector<8x32xf32>
    %95 = arith.divf %93, %94 : vector<8x32xf32>
    %96 = vector.extract_strided_slice %83 {offsets = [0, 64], sizes = [8, 32], strides = [1, 1]} : vector<8x128xf32> to vector<8x32xf32>
    %97 = math.tanh %96 : vector<8x32xf32>
    %98 = vector.extract_strided_slice %83 {offsets = [0, 96], sizes = [8, 32], strides = [1, 1]} : vector<8x128xf32> to vector<8x32xf32>
    %99 = arith.negf %98 : vector<8x32xf32>
    %100 = math.exp %99 : vector<8x32xf32>
    %cst_33 = arith.constant 1.000000e+00 : f32
    %101 = vector.broadcast %cst_33 : f32 to vector<8x32xf32>
    %102 = arith.addf %101, %100 : vector<8x32xf32>
    %103 = arith.divf %101, %102 : vector<8x32xf32>
    %104 = arith.mulf %95, %73 : vector<8x32xf32>
    %105 = arith.mulf %89, %97 : vector<8x32xf32>
    %106 = arith.addf %104, %105 : vector<8x32xf32>
    %107 = math.tanh %106 : vector<8x32xf32>
    %108 = arith.mulf %103, %107 : vector<8x32xf32>
    %109 = arith.index_cast %79 : i32 to index
    %c0_34 = arith.constant 0 : index
    %110 = vector.load %arg14[%109, %c0_34] : memref<64x32xf32, #tpu.memory_space<vmem>>, vector<8x32xf32>
    tpu.vector_store %arg14[%109, %c0_34], %108 {strides = array<i32>} : memref<64x32xf32, #tpu.memory_space<vmem>>, vector<8x32xf32>,
    %c3_i32 = arith.constant 3 : i32
    %c8_i32_35 = arith.constant 8 : i32
    %111 = arith.muli %c3_i32, %c8_i32_35 : i32
    %112 = tpu.assume_multiple %111, 8 : i32
    %113 = arith.index_cast %112 : i32 to index
    %c0_36 = arith.constant 0 : index
    %114 = vector.load %arg15[%113, %c0_36] : memref<64x128xf32, #tpu.memory_space<vmem>>, vector<8x128xf32>
    %cst_37 = arith.constant dense<0.000000e+00> : vector<8x128xf32>
    %115 = tpu.matmul %108, %1, %cst_37 {dimension_numbers = #tpu.dot_dimension_numbers<[1], [0], [0], [1], [0, 0, 1, 1], [], []>} : vector<8x32xf32>, vector<32x128xf32>, vector<8x128xf32> -> vector<8x128xf32>
    %116 = arith.addf %114, %115 : vector<8x128xf32>
    %117 = vector.extract_strided_slice %116 {offsets = [0, 0], sizes = [8, 32], strides = [1, 1]} : vector<8x128xf32> to vector<8x32xf32>
    %118 = arith.negf %117 : vector<8x32xf32>
    %119 = math.exp %118 : vector<8x32xf32>
    %cst_38 = arith.constant 1.000000e+00 : f32
    %120 = vector.broadcast %cst_38 : f32 to vector<8x32xf32>
    %121 = arith.addf %120, %119 : vector<8x32xf32>
    %122 = arith.divf %120, %121 : vector<8x32xf32>
    %123 = vector.extract_strided_slice %116 {offsets = [0, 32], sizes = [8, 32], strides = [1, 1]} : vector<8x128xf32> to vector<8x32xf32>
    %124 = arith.negf %123 : vector<8x32xf32>
    %125 = math.exp %124 : vector<8x32xf32>
    %cst_39 = arith.constant 1.000000e+00 : f32
    %126 = vector.broadcast %cst_39 : f32 to vector<8x32xf32>
    %127 = arith.addf %126, %125 : vector<8x32xf32>
    %128 = arith.divf %126, %127 : vector<8x32xf32>
    %129 = vector.extract_strided_slice %116 {offsets = [0, 64], sizes = [8, 32], strides = [1, 1]} : vector<8x128xf32> to vector<8x32xf32>
    %130 = math.tanh %129 : vector<8x32xf32>
    %131 = vector.extract_strided_slice %116 {offsets = [0, 96], sizes = [8, 32], strides = [1, 1]} : vector<8x128xf32> to vector<8x32xf32>
    %132 = arith.negf %131 : vector<8x32xf32>
    %133 = math.exp %132 : vector<8x32xf32>
    %cst_40 = arith.constant 1.000000e+00 : f32
    %134 = vector.broadcast %cst_40 : f32 to vector<8x32xf32>
    %135 = arith.addf %134, %133 : vector<8x32xf32>
    %136 = arith.divf %134, %135 : vector<8x32xf32>
    %137 = arith.mulf %128, %106 : vector<8x32xf32>
    %138 = arith.mulf %122, %130 : vector<8x32xf32>
    %139 = arith.addf %137, %138 : vector<8x32xf32>
    %140 = math.tanh %139 : vector<8x32xf32>
    %141 = arith.mulf %136, %140 : vector<8x32xf32>
    %142 = arith.index_cast %112 : i32 to index
    %c0_41 = arith.constant 0 : index
    %143 = vector.load %arg14[%142, %c0_41] : memref<64x32xf32, #tpu.memory_space<vmem>>, vector<8x32xf32>
    tpu.vector_store %arg14[%142, %c0_41], %141 {strides = array<i32>} : memref<64x32xf32, #tpu.memory_space<vmem>>, vector<8x32xf32>,
    %c4_i32 = arith.constant 4 : i32
    %c8_i32_42 = arith.constant 8 : i32
    %144 = arith.muli %c4_i32, %c8_i32_42 : i32
    %145 = tpu.assume_multiple %144, 8 : i32
    %146 = arith.index_cast %145 : i32 to index
    %c0_43 = arith.constant 0 : index
    %147 = vector.load %arg15[%146, %c0_43] : memref<64x128xf32, #tpu.memory_space<vmem>>, vector<8x128xf32>
    %cst_44 = arith.constant dense<0.000000e+00> : vector<8x128xf32>
    %148 = tpu.matmul %141, %1, %cst_44 {dimension_numbers = #tpu.dot_dimension_numbers<[1], [0], [0], [1], [0, 0, 1, 1], [], []>} : vector<8x32xf32>, vector<32x128xf32>, vector<8x128xf32> -> vector<8x128xf32>
    %149 = arith.addf %147, %148 : vector<8x128xf32>
    %150 = vector.extract_strided_slice %149 {offsets = [0, 0], sizes = [8, 32], strides = [1, 1]} : vector<8x128xf32> to vector<8x32xf32>
    %151 = arith.negf %150 : vector<8x32xf32>
    %152 = math.exp %151 : vector<8x32xf32>
    %cst_45 = arith.constant 1.000000e+00 : f32
    %153 = vector.broadcast %cst_45 : f32 to vector<8x32xf32>
    %154 = arith.addf %153, %152 : vector<8x32xf32>
    %155 = arith.divf %153, %154 : vector<8x32xf32>
    %156 = vector.extract_strided_slice %149 {offsets = [0, 32], sizes = [8, 32], strides = [1, 1]} : vector<8x128xf32> to vector<8x32xf32>
    %157 = arith.negf %156 : vector<8x32xf32>
    %158 = math.exp %157 : vector<8x32xf32>
    %cst_46 = arith.constant 1.000000e+00 : f32
    %159 = vector.broadcast %cst_46 : f32 to vector<8x32xf32>
    %160 = arith.addf %159, %158 : vector<8x32xf32>
    %161 = arith.divf %159, %160 : vector<8x32xf32>
    %162 = vector.extract_strided_slice %149 {offsets = [0, 64], sizes = [8, 32], strides = [1, 1]} : vector<8x128xf32> to vector<8x32xf32>
    %163 = math.tanh %162 : vector<8x32xf32>
    %164 = vector.extract_strided_slice %149 {offsets = [0, 96], sizes = [8, 32], strides = [1, 1]} : vector<8x128xf32> to vector<8x32xf32>
    %165 = arith.negf %164 : vector<8x32xf32>
    %166 = math.exp %165 : vector<8x32xf32>
    %cst_47 = arith.constant 1.000000e+00 : f32
    %167 = vector.broadcast %cst_47 : f32 to vector<8x32xf32>
    %168 = arith.addf %167, %166 : vector<8x32xf32>
    %169 = arith.divf %167, %168 : vector<8x32xf32>
    %170 = arith.mulf %161, %139 : vector<8x32xf32>
    %171 = arith.mulf %155, %163 : vector<8x32xf32>
    %172 = arith.addf %170, %171 : vector<8x32xf32>
    %173 = math.tanh %172 : vector<8x32xf32>
    %174 = arith.mulf %169, %173 : vector<8x32xf32>
    %175 = arith.index_cast %145 : i32 to index
    %c0_48 = arith.constant 0 : index
    %176 = vector.load %arg14[%175, %c0_48] : memref<64x32xf32, #tpu.memory_space<vmem>>, vector<8x32xf32>
    tpu.vector_store %arg14[%175, %c0_48], %174 {strides = array<i32>} : memref<64x32xf32, #tpu.memory_space<vmem>>, vector<8x32xf32>,
    %c5_i32 = arith.constant 5 : i32
    %c8_i32_49 = arith.constant 8 : i32
    %177 = arith.muli %c5_i32, %c8_i32_49 : i32
    %178 = tpu.assume_multiple %177, 8 : i32
    %179 = arith.index_cast %178 : i32 to index
    %c0_50 = arith.constant 0 : index
    %180 = vector.load %arg15[%179, %c0_50] : memref<64x128xf32, #tpu.memory_space<vmem>>, vector<8x128xf32>
    %cst_51 = arith.constant dense<0.000000e+00> : vector<8x128xf32>
    %181 = tpu.matmul %174, %1, %cst_51 {dimension_numbers = #tpu.dot_dimension_numbers<[1], [0], [0], [1], [0, 0, 1, 1], [], []>} : vector<8x32xf32>, vector<32x128xf32>, vector<8x128xf32> -> vector<8x128xf32>
    %182 = arith.addf %180, %181 : vector<8x128xf32>
    %183 = vector.extract_strided_slice %182 {offsets = [0, 0], sizes = [8, 32], strides = [1, 1]} : vector<8x128xf32> to vector<8x32xf32>
    %184 = arith.negf %183 : vector<8x32xf32>
    %185 = math.exp %184 : vector<8x32xf32>
    %cst_52 = arith.constant 1.000000e+00 : f32
    %186 = vector.broadcast %cst_52 : f32 to vector<8x32xf32>
    %187 = arith.addf %186, %185 : vector<8x32xf32>
    %188 = arith.divf %186, %187 : vector<8x32xf32>
    %189 = vector.extract_strided_slice %182 {offsets = [0, 32], sizes = [8, 32], strides = [1, 1]} : vector<8x128xf32> to vector<8x32xf32>
    %190 = arith.negf %189 : vector<8x32xf32>
    %191 = math.exp %190 : vector<8x32xf32>
    %cst_53 = arith.constant 1.000000e+00 : f32
    %192 = vector.broadcast %cst_53 : f32 to vector<8x32xf32>
    %193 = arith.addf %192, %191 : vector<8x32xf32>
    %194 = arith.divf %192, %193 : vector<8x32xf32>
    %195 = vector.extract_strided_slice %182 {offsets = [0, 64], sizes = [8, 32], strides = [1, 1]} : vector<8x128xf32> to vector<8x32xf32>
    %196 = math.tanh %195 : vector<8x32xf32>
    %197 = vector.extract_strided_slice %182 {offsets = [0, 96], sizes = [8, 32], strides = [1, 1]} : vector<8x128xf32> to vector<8x32xf32>
    %198 = arith.negf %197 : vector<8x32xf32>
    %199 = math.exp %198 : vector<8x32xf32>
    %cst_54 = arith.constant 1.000000e+00 : f32
    %200 = vector.broadcast %cst_54 : f32 to vector<8x32xf32>
    %201 = arith.addf %200, %199 : vector<8x32xf32>
    %202 = arith.divf %200, %201 : vector<8x32xf32>
    %203 = arith.mulf %194, %172 : vector<8x32xf32>
    %204 = arith.mulf %188, %196 : vector<8x32xf32>
    %205 = arith.addf %203, %204 : vector<8x32xf32>
    %206 = math.tanh %205 : vector<8x32xf32>
    %207 = arith.mulf %202, %206 : vector<8x32xf32>
    %208 = arith.index_cast %178 : i32 to index
    %c0_55 = arith.constant 0 : index
    %209 = vector.load %arg14[%208, %c0_55] : memref<64x32xf32, #tpu.memory_space<vmem>>, vector<8x32xf32>
    tpu.vector_store %arg14[%208, %c0_55], %207 {strides = array<i32>} : memref<64x32xf32, #tpu.memory_space<vmem>>, vector<8x32xf32>,
    %c6_i32 = arith.constant 6 : i32
    %c8_i32_56 = arith.constant 8 : i32
    %210 = arith.muli %c6_i32, %c8_i32_56 : i32
    %211 = tpu.assume_multiple %210, 8 : i32
    %212 = arith.index_cast %211 : i32 to index
    %c0_57 = arith.constant 0 : index
    %213 = vector.load %arg15[%212, %c0_57] : memref<64x128xf32, #tpu.memory_space<vmem>>, vector<8x128xf32>
    %cst_58 = arith.constant dense<0.000000e+00> : vector<8x128xf32>
    %214 = tpu.matmul %207, %1, %cst_58 {dimension_numbers = #tpu.dot_dimension_numbers<[1], [0], [0], [1], [0, 0, 1, 1], [], []>} : vector<8x32xf32>, vector<32x128xf32>, vector<8x128xf32> -> vector<8x128xf32>
    %215 = arith.addf %213, %214 : vector<8x128xf32>
    %216 = vector.extract_strided_slice %215 {offsets = [0, 0], sizes = [8, 32], strides = [1, 1]} : vector<8x128xf32> to vector<8x32xf32>
    %217 = arith.negf %216 : vector<8x32xf32>
    %218 = math.exp %217 : vector<8x32xf32>
    %cst_59 = arith.constant 1.000000e+00 : f32
    %219 = vector.broadcast %cst_59 : f32 to vector<8x32xf32>
    %220 = arith.addf %219, %218 : vector<8x32xf32>
    %221 = arith.divf %219, %220 : vector<8x32xf32>
    %222 = vector.extract_strided_slice %215 {offsets = [0, 32], sizes = [8, 32], strides = [1, 1]} : vector<8x128xf32> to vector<8x32xf32>
    %223 = arith.negf %222 : vector<8x32xf32>
    %224 = math.exp %223 : vector<8x32xf32>
    %cst_60 = arith.constant 1.000000e+00 : f32
    %225 = vector.broadcast %cst_60 : f32 to vector<8x32xf32>
    %226 = arith.addf %225, %224 : vector<8x32xf32>
    %227 = arith.divf %225, %226 : vector<8x32xf32>
    %228 = vector.extract_strided_slice %215 {offsets = [0, 64], sizes = [8, 32], strides = [1, 1]} : vector<8x128xf32> to vector<8x32xf32>
    %229 = math.tanh %228 : vector<8x32xf32>
    %230 = vector.extract_strided_slice %215 {offsets = [0, 96], sizes = [8, 32], strides = [1, 1]} : vector<8x128xf32> to vector<8x32xf32>
    %231 = arith.negf %230 : vector<8x32xf32>
    %232 = math.exp %231 : vector<8x32xf32>
    %cst_61 = arith.constant 1.000000e+00 : f32
    %233 = vector.broadcast %cst_61 : f32 to vector<8x32xf32>
    %234 = arith.addf %233, %232 : vector<8x32xf32>
    %235 = arith.divf %233, %234 : vector<8x32xf32>
    %236 = arith.mulf %227, %205 : vector<8x32xf32>
    %237 = arith.mulf %221, %229 : vector<8x32xf32>
    %238 = arith.addf %236, %237 : vector<8x32xf32>
    %239 = math.tanh %238 : vector<8x32xf32>
    %240 = arith.mulf %235, %239 : vector<8x32xf32>
    %241 = arith.index_cast %211 : i32 to index
    %c0_62 = arith.constant 0 : index
    %242 = vector.load %arg14[%241, %c0_62] : memref<64x32xf32, #tpu.memory_space<vmem>>, vector<8x32xf32>
    tpu.vector_store %arg14[%241, %c0_62], %240 {strides = array<i32>} : memref<64x32xf32, #tpu.memory_space<vmem>>, vector<8x32xf32>,
    %c7_i32 = arith.constant 7 : i32
    %c8_i32_63 = arith.constant 8 : i32
    %243 = arith.muli %c7_i32, %c8_i32_63 : i32
    %244 = tpu.assume_multiple %243, 8 : i32
    %245 = arith.index_cast %244 : i32 to index
    %c0_64 = arith.constant 0 : index
    %246 = vector.load %arg15[%245, %c0_64] : memref<64x128xf32, #tpu.memory_space<vmem>>, vector<8x128xf32>
    %cst_65 = arith.constant dense<0.000000e+00> : vector<8x128xf32>
    %247 = tpu.matmul %240, %1, %cst_65 {dimension_numbers = #tpu.dot_dimension_numbers<[1], [0], [0], [1], [0, 0, 1, 1], [], []>} : vector<8x32xf32>, vector<32x128xf32>, vector<8x128xf32> -> vector<8x128xf32>
    %248 = arith.addf %246, %247 : vector<8x128xf32>
    %249 = vector.extract_strided_slice %248 {offsets = [0, 0], sizes = [8, 32], strides = [1, 1]} : vector<8x128xf32> to vector<8x32xf32>
    %250 = arith.negf %249 : vector<8x32xf32>
    %251 = math.exp %250 : vector<8x32xf32>
    %cst_66 = arith.constant 1.000000e+00 : f32
    %252 = vector.broadcast %cst_66 : f32 to vector<8x32xf32>
    %253 = arith.addf %252, %251 : vector<8x32xf32>
    %254 = arith.divf %252, %253 : vector<8x32xf32>
    %255 = vector.extract_strided_slice %248 {offsets = [0, 32], sizes = [8, 32], strides = [1, 1]} : vector<8x128xf32> to vector<8x32xf32>
    %256 = arith.negf %255 : vector<8x32xf32>
    %257 = math.exp %256 : vector<8x32xf32>
    %cst_67 = arith.constant 1.000000e+00 : f32
    %258 = vector.broadcast %cst_67 : f32 to vector<8x32xf32>
    %259 = arith.addf %258, %257 : vector<8x32xf32>
    %260 = arith.divf %258, %259 : vector<8x32xf32>
    %261 = vector.extract_strided_slice %248 {offsets = [0, 64], sizes = [8, 32], strides = [1, 1]} : vector<8x128xf32> to vector<8x32xf32>
    %262 = math.tanh %261 : vector<8x32xf32>
    %263 = vector.extract_strided_slice %248 {offsets = [0, 96], sizes = [8, 32], strides = [1, 1]} : vector<8x128xf32> to vector<8x32xf32>
    %264 = arith.negf %263 : vector<8x32xf32>
    %265 = math.exp %264 : vector<8x32xf32>
    %cst_68 = arith.constant 1.000000e+00 : f32
    %266 = vector.broadcast %cst_68 : f32 to vector<8x32xf32>
    %267 = arith.addf %266, %265 : vector<8x32xf32>
    %268 = arith.divf %266, %267 : vector<8x32xf32>
    %269 = arith.mulf %260, %238 : vector<8x32xf32>
    %270 = arith.mulf %254, %262 : vector<8x32xf32>
    %271 = arith.addf %269, %270 : vector<8x32xf32>
    %272 = math.tanh %271 : vector<8x32xf32>
    %273 = arith.mulf %268, %272 : vector<8x32xf32>
    %274 = arith.index_cast %244 : i32 to index
    %c0_69 = arith.constant 0 : index
    %275 = vector.load %arg14[%274, %c0_69] : memref<64x32xf32, #tpu.memory_space<vmem>>, vector<8x32xf32>
    tpu.vector_store %arg14[%274, %c0_69], %273 {strides = array<i32>} : memref<64x32xf32, #tpu.memory_space<vmem>>, vector<8x32xf32>,
    %c8_i32_70 = arith.constant 8 : i32
    %c0_71 = arith.constant 0 : index
    %c0_72 = arith.constant 0 : index
    %c0_73 = arith.constant 0 : index
    %276 = vector.load %arg12[%c0_71, %c0_72, %c0_73] : memref<2x8x32xf32, #tpu.memory_space<vmem>>, vector<1x8x32xf32>
    %277 = vector.shape_cast %276 : vector<1x8x32xf32> to vector<8x32xf32>
    %278 = vector.shape_cast %273 : vector<8x32xf32> to vector<1x8x32xf32>
    tpu.vector_store %arg12[%c0_71, %c0_72, %c0_73], %278 {strides = array<i32>} : memref<2x8x32xf32, #tpu.memory_space<vmem>>, vector<1x8x32xf32>,
    %c0_74 = arith.constant 0 : index
    %c0_75 = arith.constant 0 : index
    %c0_76 = arith.constant 0 : index
    %279 = vector.load %arg13[%c0_74, %c0_75, %c0_76] : memref<2x8x32xf32, #tpu.memory_space<vmem>>, vector<1x8x32xf32>
    %280 = vector.shape_cast %279 : vector<1x8x32xf32> to vector<8x32xf32>
    %281 = vector.shape_cast %271 : vector<8x32xf32> to vector<1x8x32xf32>
    tpu.vector_store %arg13[%c0_74, %c0_75, %c0_76], %281 {strides = array<i32>} : memref<2x8x32xf32, #tpu.memory_space<vmem>>, vector<1x8x32xf32>,
    %c0_77 = arith.constant 0 : index
    %c0_78 = arith.constant 0 : index
    %282 = vector.load %arg6[%c0_77, %c0_78] : memref<32x128xf32, #tpu.memory_space<vmem>>, vector<32x128xf32>
    %c0_79 = arith.constant 0 : index
    %c0_80 = arith.constant 0 : index
    %283 = vector.load %arg7[%c0_79, %c0_80] : memref<32x128xf32, #tpu.memory_space<vmem>>, vector<32x128xf32>
    %c0_81 = arith.constant 0 : index
    %c0_82 = arith.constant 0 : index
    %284 = vector.load %arg8[%c0_81, %c0_82] : memref<1x128xf32, #tpu.memory_space<vmem>>, vector<1x128xf32>
    %c0_83 = arith.constant 0 : index
    %c0_84 = arith.constant 0 : index
    %285 = vector.load %arg14[%c0_83, %c0_84] : memref<64x32xf32, #tpu.memory_space<vmem>>, vector<64x32xf32>
    %cst_85 = arith.constant dense<0.000000e+00> : vector<64x128xf32>
    %286 = tpu.matmul %285, %282, %cst_85 {dimension_numbers = #tpu.dot_dimension_numbers<[1], [0], [0], [1], [0, 0, 1, 1], [], []>} : vector<64x32xf32>, vector<32x128xf32>, vector<64x128xf32> -> vector<64x128xf32>
    %287 = vector.broadcast %284 : vector<1x128xf32> to vector<64x128xf32>
    %288 = arith.addf %286, %287 : vector<64x128xf32>
    %c0_86 = arith.constant 0 : index
    %c0_87 = arith.constant 0 : index
    %289 = vector.load %arg15[%c0_86, %c0_87] : memref<64x128xf32, #tpu.memory_space<vmem>>, vector<64x128xf32>
    tpu.vector_store %arg15[%c0_86, %c0_87], %288 {strides = array<i32>} : memref<64x128xf32, #tpu.memory_space<vmem>>, vector<64x128xf32>,
    %c1 = arith.constant 1 : index
    %c0_88 = arith.constant 0 : index
    %c0_89 = arith.constant 0 : index
    %290 = vector.load %arg1[%c1, %c0_88, %c0_89] : memref<2x8x32xf32, #tpu.memory_space<vmem>>, vector<1x8x32xf32>
    %291 = vector.shape_cast %290 : vector<1x8x32xf32> to vector<8x32xf32>
    %c1_90 = arith.constant 1 : index
    %c0_91 = arith.constant 0 : index
    %c0_92 = arith.constant 0 : index
    %292 = vector.load %arg2[%c1_90, %c0_91, %c0_92] : memref<2x8x32xf32, #tpu.memory_space<vmem>>, vector<1x8x32xf32>
    %293 = vector.shape_cast %292 : vector<1x8x32xf32> to vector<8x32xf32>
    %c0_i32_93 = arith.constant 0 : i32
    %c8_i32_94 = arith.constant 8 : i32
    %294 = arith.muli %c0_i32_93, %c8_i32_94 : i32
    %295 = tpu.assume_multiple %294, 8 : i32
    %296 = arith.index_cast %295 : i32 to index
    %c0_95 = arith.constant 0 : index
    %297 = vector.load %arg15[%296, %c0_95] : memref<64x128xf32, #tpu.memory_space<vmem>>, vector<8x128xf32>
    %cst_96 = arith.constant dense<0.000000e+00> : vector<8x128xf32>
    %298 = tpu.matmul %291, %283, %cst_96 {dimension_numbers = #tpu.dot_dimension_numbers<[1], [0], [0], [1], [0, 0, 1, 1], [], []>} : vector<8x32xf32>, vector<32x128xf32>, vector<8x128xf32> -> vector<8x128xf32>
    %299 = arith.addf %297, %298 : vector<8x128xf32>
    %300 = vector.extract_strided_slice %299 {offsets = [0, 0], sizes = [8, 32], strides = [1, 1]} : vector<8x128xf32> to vector<8x32xf32>
    %301 = arith.negf %300 : vector<8x32xf32>
    %302 = math.exp %301 : vector<8x32xf32>
    %cst_97 = arith.constant 1.000000e+00 : f32
    %303 = vector.broadcast %cst_97 : f32 to vector<8x32xf32>
    %304 = arith.addf %303, %302 : vector<8x32xf32>
    %305 = arith.divf %303, %304 : vector<8x32xf32>
    %306 = vector.extract_strided_slice %299 {offsets = [0, 32], sizes = [8, 32], strides = [1, 1]} : vector<8x128xf32> to vector<8x32xf32>
    %307 = arith.negf %306 : vector<8x32xf32>
    %308 = math.exp %307 : vector<8x32xf32>
    %cst_98 = arith.constant 1.000000e+00 : f32
    %309 = vector.broadcast %cst_98 : f32 to vector<8x32xf32>
    %310 = arith.addf %309, %308 : vector<8x32xf32>
    %311 = arith.divf %309, %310 : vector<8x32xf32>
    %312 = vector.extract_strided_slice %299 {offsets = [0, 64], sizes = [8, 32], strides = [1, 1]} : vector<8x128xf32> to vector<8x32xf32>
    %313 = math.tanh %312 : vector<8x32xf32>
    %314 = vector.extract_strided_slice %299 {offsets = [0, 96], sizes = [8, 32], strides = [1, 1]} : vector<8x128xf32> to vector<8x32xf32>
    %315 = arith.negf %314 : vector<8x32xf32>
    %316 = math.exp %315 : vector<8x32xf32>
    %cst_99 = arith.constant 1.000000e+00 : f32
    %317 = vector.broadcast %cst_99 : f32 to vector<8x32xf32>
    %318 = arith.addf %317, %316 : vector<8x32xf32>
    %319 = arith.divf %317, %318 : vector<8x32xf32>
    %320 = arith.mulf %311, %293 : vector<8x32xf32>
    %321 = arith.mulf %305, %313 : vector<8x32xf32>
    %322 = arith.addf %320, %321 : vector<8x32xf32>
    %323 = math.tanh %322 : vector<8x32xf32>
    %324 = arith.mulf %319, %323 : vector<8x32xf32>
    %325 = arith.index_cast %295 : i32 to index
    %c0_100 = arith.constant 0 : index
    %326 = vector.load %arg14[%325, %c0_100] : memref<64x32xf32, #tpu.memory_space<vmem>>, vector<8x32xf32>
    tpu.vector_store %arg14[%325, %c0_100], %324 {strides = array<i32>} : memref<64x32xf32, #tpu.memory_space<vmem>>, vector<8x32xf32>,
    %c1_i32_101 = arith.constant 1 : i32
    %c8_i32_102 = arith.constant 8 : i32
    %327 = arith.muli %c1_i32_101, %c8_i32_102 : i32
    %328 = tpu.assume_multiple %327, 8 : i32
    %329 = arith.index_cast %328 : i32 to index
    %c0_103 = arith.constant 0 : index
    %330 = vector.load %arg15[%329, %c0_103] : memref<64x128xf32, #tpu.memory_space<vmem>>, vector<8x128xf32>
    %cst_104 = arith.constant dense<0.000000e+00> : vector<8x128xf32>
    %331 = tpu.matmul %324, %283, %cst_104 {dimension_numbers = #tpu.dot_dimension_numbers<[1], [0], [0], [1], [0, 0, 1, 1], [], []>} : vector<8x32xf32>, vector<32x128xf32>, vector<8x128xf32> -> vector<8x128xf32>
    %332 = arith.addf %330, %331 : vector<8x128xf32>
    %333 = vector.extract_strided_slice %332 {offsets = [0, 0], sizes = [8, 32], strides = [1, 1]} : vector<8x128xf32> to vector<8x32xf32>
    %334 = arith.negf %333 : vector<8x32xf32>
    %335 = math.exp %334 : vector<8x32xf32>
    %cst_105 = arith.constant 1.000000e+00 : f32
    %336 = vector.broadcast %cst_105 : f32 to vector<8x32xf32>
    %337 = arith.addf %336, %335 : vector<8x32xf32>
    %338 = arith.divf %336, %337 : vector<8x32xf32>
    %339 = vector.extract_strided_slice %332 {offsets = [0, 32], sizes = [8, 32], strides = [1, 1]} : vector<8x128xf32> to vector<8x32xf32>
    %340 = arith.negf %339 : vector<8x32xf32>
    %341 = math.exp %340 : vector<8x32xf32>
    %cst_106 = arith.constant 1.000000e+00 : f32
    %342 = vector.broadcast %cst_106 : f32 to vector<8x32xf32>
    %343 = arith.addf %342, %341 : vector<8x32xf32>
    %344 = arith.divf %342, %343 : vector<8x32xf32>
    %345 = vector.extract_strided_slice %332 {offsets = [0, 64], sizes = [8, 32], strides = [1, 1]} : vector<8x128xf32> to vector<8x32xf32>
    %346 = math.tanh %345 : vector<8x32xf32>
    %347 = vector.extract_strided_slice %332 {offsets = [0, 96], sizes = [8, 32], strides = [1, 1]} : vector<8x128xf32> to vector<8x32xf32>
    %348 = arith.negf %347 : vector<8x32xf32>
    %349 = math.exp %348 : vector<8x32xf32>
    %cst_107 = arith.constant 1.000000e+00 : f32
    %350 = vector.broadcast %cst_107 : f32 to vector<8x32xf32>
    %351 = arith.addf %350, %349 : vector<8x32xf32>
    %352 = arith.divf %350, %351 : vector<8x32xf32>
    %353 = arith.mulf %344, %322 : vector<8x32xf32>
    %354 = arith.mulf %338, %346 : vector<8x32xf32>
    %355 = arith.addf %353, %354 : vector<8x32xf32>
    %356 = math.tanh %355 : vector<8x32xf32>
    %357 = arith.mulf %352, %356 : vector<8x32xf32>
    %358 = arith.index_cast %328 : i32 to index
    %c0_108 = arith.constant 0 : index
    %359 = vector.load %arg14[%358, %c0_108] : memref<64x32xf32, #tpu.memory_space<vmem>>, vector<8x32xf32>
    tpu.vector_store %arg14[%358, %c0_108], %357 {strides = array<i32>} : memref<64x32xf32, #tpu.memory_space<vmem>>, vector<8x32xf32>,
    %c2_i32_109 = arith.constant 2 : i32
    %c8_i32_110 = arith.constant 8 : i32
    %360 = arith.muli %c2_i32_109, %c8_i32_110 : i32
    %361 = tpu.assume_multiple %360, 8 : i32
    %362 = arith.index_cast %361 : i32 to index
    %c0_111 = arith.constant 0 : index
    %363 = vector.load %arg15[%362, %c0_111] : memref<64x128xf32, #tpu.memory_space<vmem>>, vector<8x128xf32>
    %cst_112 = arith.constant dense<0.000000e+00> : vector<8x128xf32>
    %364 = tpu.matmul %357, %283, %cst_112 {dimension_numbers = #tpu.dot_dimension_numbers<[1], [0], [0], [1], [0, 0, 1, 1], [], []>} : vector<8x32xf32>, vector<32x128xf32>, vector<8x128xf32> -> vector<8x128xf32>
    %365 = arith.addf %363, %364 : vector<8x128xf32>
    %366 = vector.extract_strided_slice %365 {offsets = [0, 0], sizes = [8, 32], strides = [1, 1]} : vector<8x128xf32> to vector<8x32xf32>
    %367 = arith.negf %366 : vector<8x32xf32>
    %368 = math.exp %367 : vector<8x32xf32>
    %cst_113 = arith.constant 1.000000e+00 : f32
    %369 = vector.broadcast %cst_113 : f32 to vector<8x32xf32>
    %370 = arith.addf %369, %368 : vector<8x32xf32>
    %371 = arith.divf %369, %370 : vector<8x32xf32>
    %372 = vector.extract_strided_slice %365 {offsets = [0, 32], sizes = [8, 32], strides = [1, 1]} : vector<8x128xf32> to vector<8x32xf32>
    %373 = arith.negf %372 : vector<8x32xf32>
    %374 = math.exp %373 : vector<8x32xf32>
    %cst_114 = arith.constant 1.000000e+00 : f32
    %375 = vector.broadcast %cst_114 : f32 to vector<8x32xf32>
    %376 = arith.addf %375, %374 : vector<8x32xf32>
    %377 = arith.divf %375, %376 : vector<8x32xf32>
    %378 = vector.extract_strided_slice %365 {offsets = [0, 64], sizes = [8, 32], strides = [1, 1]} : vector<8x128xf32> to vector<8x32xf32>
    %379 = math.tanh %378 : vector<8x32xf32>
    %380 = vector.extract_strided_slice %365 {offsets = [0, 96], sizes = [8, 32], strides = [1, 1]} : vector<8x128xf32> to vector<8x32xf32>
    %381 = arith.negf %380 : vector<8x32xf32>
    %382 = math.exp %381 : vector<8x32xf32>
    %cst_115 = arith.constant 1.000000e+00 : f32
    %383 = vector.broadcast %cst_115 : f32 to vector<8x32xf32>
    %384 = arith.addf %383, %382 : vector<8x32xf32>
    %385 = arith.divf %383, %384 : vector<8x32xf32>
    %386 = arith.mulf %377, %355 : vector<8x32xf32>
    %387 = arith.mulf %371, %379 : vector<8x32xf32>
    %388 = arith.addf %386, %387 : vector<8x32xf32>
    %389 = math.tanh %388 : vector<8x32xf32>
    %390 = arith.mulf %385, %389 : vector<8x32xf32>
    %391 = arith.index_cast %361 : i32 to index
    %c0_116 = arith.constant 0 : index
    %392 = vector.load %arg14[%391, %c0_116] : memref<64x32xf32, #tpu.memory_space<vmem>>, vector<8x32xf32>
    tpu.vector_store %arg14[%391, %c0_116], %390 {strides = array<i32>} : memref<64x32xf32, #tpu.memory_space<vmem>>, vector<8x32xf32>,
    %c3_i32_117 = arith.constant 3 : i32
    %c8_i32_118 = arith.constant 8 : i32
    %393 = arith.muli %c3_i32_117, %c8_i32_118 : i32
    %394 = tpu.assume_multiple %393, 8 : i32
    %395 = arith.index_cast %394 : i32 to index
    %c0_119 = arith.constant 0 : index
    %396 = vector.load %arg15[%395, %c0_119] : memref<64x128xf32, #tpu.memory_space<vmem>>, vector<8x128xf32>
    %cst_120 = arith.constant dense<0.000000e+00> : vector<8x128xf32>
    %397 = tpu.matmul %390, %283, %cst_120 {dimension_numbers = #tpu.dot_dimension_numbers<[1], [0], [0], [1], [0, 0, 1, 1], [], []>} : vector<8x32xf32>, vector<32x128xf32>, vector<8x128xf32> -> vector<8x128xf32>
    %398 = arith.addf %396, %397 : vector<8x128xf32>
    %399 = vector.extract_strided_slice %398 {offsets = [0, 0], sizes = [8, 32], strides = [1, 1]} : vector<8x128xf32> to vector<8x32xf32>
    %400 = arith.negf %399 : vector<8x32xf32>
    %401 = math.exp %400 : vector<8x32xf32>
    %cst_121 = arith.constant 1.000000e+00 : f32
    %402 = vector.broadcast %cst_121 : f32 to vector<8x32xf32>
    %403 = arith.addf %402, %401 : vector<8x32xf32>
    %404 = arith.divf %402, %403 : vector<8x32xf32>
    %405 = vector.extract_strided_slice %398 {offsets = [0, 32], sizes = [8, 32], strides = [1, 1]} : vector<8x128xf32> to vector<8x32xf32>
    %406 = arith.negf %405 : vector<8x32xf32>
    %407 = math.exp %406 : vector<8x32xf32>
    %cst_122 = arith.constant 1.000000e+00 : f32
    %408 = vector.broadcast %cst_122 : f32 to vector<8x32xf32>
    %409 = arith.addf %408, %407 : vector<8x32xf32>
    %410 = arith.divf %408, %409 : vector<8x32xf32>
    %411 = vector.extract_strided_slice %398 {offsets = [0, 64], sizes = [8, 32], strides = [1, 1]} : vector<8x128xf32> to vector<8x32xf32>
    %412 = math.tanh %411 : vector<8x32xf32>
    %413 = vector.extract_strided_slice %398 {offsets = [0, 96], sizes = [8, 32], strides = [1, 1]} : vector<8x128xf32> to vector<8x32xf32>
    %414 = arith.negf %413 : vector<8x32xf32>
    %415 = math.exp %414 : vector<8x32xf32>
    %cst_123 = arith.constant 1.000000e+00 : f32
    %416 = vector.broadcast %cst_123 : f32 to vector<8x32xf32>
    %417 = arith.addf %416, %415 : vector<8x32xf32>
    %418 = arith.divf %416, %417 : vector<8x32xf32>
    %419 = arith.mulf %410, %388 : vector<8x32xf32>
    %420 = arith.mulf %404, %412 : vector<8x32xf32>
    %421 = arith.addf %419, %420 : vector<8x32xf32>
    %422 = math.tanh %421 : vector<8x32xf32>
    %423 = arith.mulf %418, %422 : vector<8x32xf32>
    %424 = arith.index_cast %394 : i32 to index
    %c0_124 = arith.constant 0 : index
    %425 = vector.load %arg14[%424, %c0_124] : memref<64x32xf32, #tpu.memory_space<vmem>>, vector<8x32xf32>
    tpu.vector_store %arg14[%424, %c0_124], %423 {strides = array<i32>} : memref<64x32xf32, #tpu.memory_space<vmem>>, vector<8x32xf32>,
    %c4_i32_125 = arith.constant 4 : i32
    %c8_i32_126 = arith.constant 8 : i32
    %426 = arith.muli %c4_i32_125, %c8_i32_126 : i32
    %427 = tpu.assume_multiple %426, 8 : i32
    %428 = arith.index_cast %427 : i32 to index
    %c0_127 = arith.constant 0 : index
    %429 = vector.load %arg15[%428, %c0_127] : memref<64x128xf32, #tpu.memory_space<vmem>>, vector<8x128xf32>
    %cst_128 = arith.constant dense<0.000000e+00> : vector<8x128xf32>
    %430 = tpu.matmul %423, %283, %cst_128 {dimension_numbers = #tpu.dot_dimension_numbers<[1], [0], [0], [1], [0, 0, 1, 1], [], []>} : vector<8x32xf32>, vector<32x128xf32>, vector<8x128xf32> -> vector<8x128xf32>
    %431 = arith.addf %429, %430 : vector<8x128xf32>
    %432 = vector.extract_strided_slice %431 {offsets = [0, 0], sizes = [8, 32], strides = [1, 1]} : vector<8x128xf32> to vector<8x32xf32>
    %433 = arith.negf %432 : vector<8x32xf32>
    %434 = math.exp %433 : vector<8x32xf32>
    %cst_129 = arith.constant 1.000000e+00 : f32
    %435 = vector.broadcast %cst_129 : f32 to vector<8x32xf32>
    %436 = arith.addf %435, %434 : vector<8x32xf32>
    %437 = arith.divf %435, %436 : vector<8x32xf32>
    %438 = vector.extract_strided_slice %431 {offsets = [0, 32], sizes = [8, 32], strides = [1, 1]} : vector<8x128xf32> to vector<8x32xf32>
    %439 = arith.negf %438 : vector<8x32xf32>
    %440 = math.exp %439 : vector<8x32xf32>
    %cst_130 = arith.constant 1.000000e+00 : f32
    %441 = vector.broadcast %cst_130 : f32 to vector<8x32xf32>
    %442 = arith.addf %441, %440 : vector<8x32xf32>
    %443 = arith.divf %441, %442 : vector<8x32xf32>
    %444 = vector.extract_strided_slice %431 {offsets = [0, 64], sizes = [8, 32], strides = [1, 1]} : vector<8x128xf32> to vector<8x32xf32>
    %445 = math.tanh %444 : vector<8x32xf32>
    %446 = vector.extract_strided_slice %431 {offsets = [0, 96], sizes = [8, 32], strides = [1, 1]} : vector<8x128xf32> to vector<8x32xf32>
    %447 = arith.negf %446 : vector<8x32xf32>
    %448 = math.exp %447 : vector<8x32xf32>
    %cst_131 = arith.constant 1.000000e+00 : f32
    %449 = vector.broadcast %cst_131 : f32 to vector<8x32xf32>
    %450 = arith.addf %449, %448 : vector<8x32xf32>
    %451 = arith.divf %449, %450 : vector<8x32xf32>
    %452 = arith.mulf %443, %421 : vector<8x32xf32>
    %453 = arith.mulf %437, %445 : vector<8x32xf32>
    %454 = arith.addf %452, %453 : vector<8x32xf32>
    %455 = math.tanh %454 : vector<8x32xf32>
    %456 = arith.mulf %451, %455 : vector<8x32xf32>
    %457 = arith.index_cast %427 : i32 to index
    %c0_132 = arith.constant 0 : index
    %458 = vector.load %arg14[%457, %c0_132] : memref<64x32xf32, #tpu.memory_space<vmem>>, vector<8x32xf32>
    tpu.vector_store %arg14[%457, %c0_132], %456 {strides = array<i32>} : memref<64x32xf32, #tpu.memory_space<vmem>>, vector<8x32xf32>,
    %c5_i32_133 = arith.constant 5 : i32
    %c8_i32_134 = arith.constant 8 : i32
    %459 = arith.muli %c5_i32_133, %c8_i32_134 : i32
    %460 = tpu.assume_multiple %459, 8 : i32
    %461 = arith.index_cast %460 : i32 to index
    %c0_135 = arith.constant 0 : index
    %462 = vector.load %arg15[%461, %c0_135] : memref<64x128xf32, #tpu.memory_space<vmem>>, vector<8x128xf32>
    %cst_136 = arith.constant dense<0.000000e+00> : vector<8x128xf32>
    %463 = tpu.matmul %456, %283, %cst_136 {dimension_numbers = #tpu.dot_dimension_numbers<[1], [0], [0], [1], [0, 0, 1, 1], [], []>} : vector<8x32xf32>, vector<32x128xf32>, vector<8x128xf32> -> vector<8x128xf32>
    %464 = arith.addf %462, %463 : vector<8x128xf32>
    %465 = vector.extract_strided_slice %464 {offsets = [0, 0], sizes = [8, 32], strides = [1, 1]} : vector<8x128xf32> to vector<8x32xf32>
    %466 = arith.negf %465 : vector<8x32xf32>
    %467 = math.exp %466 : vector<8x32xf32>
    %cst_137 = arith.constant 1.000000e+00 : f32
    %468 = vector.broadcast %cst_137 : f32 to vector<8x32xf32>
    %469 = arith.addf %468, %467 : vector<8x32xf32>
    %470 = arith.divf %468, %469 : vector<8x32xf32>
    %471 = vector.extract_strided_slice %464 {offsets = [0, 32], sizes = [8, 32], strides = [1, 1]} : vector<8x128xf32> to vector<8x32xf32>
    %472 = arith.negf %471 : vector<8x32xf32>
    %473 = math.exp %472 : vector<8x32xf32>
    %cst_138 = arith.constant 1.000000e+00 : f32
    %474 = vector.broadcast %cst_138 : f32 to vector<8x32xf32>
    %475 = arith.addf %474, %473 : vector<8x32xf32>
    %476 = arith.divf %474, %475 : vector<8x32xf32>
    %477 = vector.extract_strided_slice %464 {offsets = [0, 64], sizes = [8, 32], strides = [1, 1]} : vector<8x128xf32> to vector<8x32xf32>
    %478 = math.tanh %477 : vector<8x32xf32>
    %479 = vector.extract_strided_slice %464 {offsets = [0, 96], sizes = [8, 32], strides = [1, 1]} : vector<8x128xf32> to vector<8x32xf32>
    %480 = arith.negf %479 : vector<8x32xf32>
    %481 = math.exp %480 : vector<8x32xf32>
    %cst_139 = arith.constant 1.000000e+00 : f32
    %482 = vector.broadcast %cst_139 : f32 to vector<8x32xf32>
    %483 = arith.addf %482, %481 : vector<8x32xf32>
    %484 = arith.divf %482, %483 : vector<8x32xf32>
    %485 = arith.mulf %476, %454 : vector<8x32xf32>
    %486 = arith.mulf %470, %478 : vector<8x32xf32>
    %487 = arith.addf %485, %486 : vector<8x32xf32>
    %488 = math.tanh %487 : vector<8x32xf32>
    %489 = arith.mulf %484, %488 : vector<8x32xf32>
    %490 = arith.index_cast %460 : i32 to index
    %c0_140 = arith.constant 0 : index
    %491 = vector.load %arg14[%490, %c0_140] : memref<64x32xf32, #tpu.memory_space<vmem>>, vector<8x32xf32>
    tpu.vector_store %arg14[%490, %c0_140], %489 {strides = array<i32>} : memref<64x32xf32, #tpu.memory_space<vmem>>, vector<8x32xf32>,
    %c6_i32_141 = arith.constant 6 : i32
    %c8_i32_142 = arith.constant 8 : i32
    %492 = arith.muli %c6_i32_141, %c8_i32_142 : i32
    %493 = tpu.assume_multiple %492, 8 : i32
    %494 = arith.index_cast %493 : i32 to index
    %c0_143 = arith.constant 0 : index
    %495 = vector.load %arg15[%494, %c0_143] : memref<64x128xf32, #tpu.memory_space<vmem>>, vector<8x128xf32>
    %cst_144 = arith.constant dense<0.000000e+00> : vector<8x128xf32>
    %496 = tpu.matmul %489, %283, %cst_144 {dimension_numbers = #tpu.dot_dimension_numbers<[1], [0], [0], [1], [0, 0, 1, 1], [], []>} : vector<8x32xf32>, vector<32x128xf32>, vector<8x128xf32> -> vector<8x128xf32>
    %497 = arith.addf %495, %496 : vector<8x128xf32>
    %498 = vector.extract_strided_slice %497 {offsets = [0, 0], sizes = [8, 32], strides = [1, 1]} : vector<8x128xf32> to vector<8x32xf32>
    %499 = arith.negf %498 : vector<8x32xf32>
    %500 = math.exp %499 : vector<8x32xf32>
    %cst_145 = arith.constant 1.000000e+00 : f32
    %501 = vector.broadcast %cst_145 : f32 to vector<8x32xf32>
    %502 = arith.addf %501, %500 : vector<8x32xf32>
    %503 = arith.divf %501, %502 : vector<8x32xf32>
    %504 = vector.extract_strided_slice %497 {offsets = [0, 32], sizes = [8, 32], strides = [1, 1]} : vector<8x128xf32> to vector<8x32xf32>
    %505 = arith.negf %504 : vector<8x32xf32>
    %506 = math.exp %505 : vector<8x32xf32>
    %cst_146 = arith.constant 1.000000e+00 : f32
    %507 = vector.broadcast %cst_146 : f32 to vector<8x32xf32>
    %508 = arith.addf %507, %506 : vector<8x32xf32>
    %509 = arith.divf %507, %508 : vector<8x32xf32>
    %510 = vector.extract_strided_slice %497 {offsets = [0, 64], sizes = [8, 32], strides = [1, 1]} : vector<8x128xf32> to vector<8x32xf32>
    %511 = math.tanh %510 : vector<8x32xf32>
    %512 = vector.extract_strided_slice %497 {offsets = [0, 96], sizes = [8, 32], strides = [1, 1]} : vector<8x128xf32> to vector<8x32xf32>
    %513 = arith.negf %512 : vector<8x32xf32>
    %514 = math.exp %513 : vector<8x32xf32>
    %cst_147 = arith.constant 1.000000e+00 : f32
    %515 = vector.broadcast %cst_147 : f32 to vector<8x32xf32>
    %516 = arith.addf %515, %514 : vector<8x32xf32>
    %517 = arith.divf %515, %516 : vector<8x32xf32>
    %518 = arith.mulf %509, %487 : vector<8x32xf32>
    %519 = arith.mulf %503, %511 : vector<8x32xf32>
    %520 = arith.addf %518, %519 : vector<8x32xf32>
    %521 = math.tanh %520 : vector<8x32xf32>
    %522 = arith.mulf %517, %521 : vector<8x32xf32>
    %523 = arith.index_cast %493 : i32 to index
    %c0_148 = arith.constant 0 : index
    %524 = vector.load %arg14[%523, %c0_148] : memref<64x32xf32, #tpu.memory_space<vmem>>, vector<8x32xf32>
    tpu.vector_store %arg14[%523, %c0_148], %522 {strides = array<i32>} : memref<64x32xf32, #tpu.memory_space<vmem>>, vector<8x32xf32>,
    %c7_i32_149 = arith.constant 7 : i32
    %c8_i32_150 = arith.constant 8 : i32
    %525 = arith.muli %c7_i32_149, %c8_i32_150 : i32
    %526 = tpu.assume_multiple %525, 8 : i32
    %527 = arith.index_cast %526 : i32 to index
    %c0_151 = arith.constant 0 : index
    %528 = vector.load %arg15[%527, %c0_151] : memref<64x128xf32, #tpu.memory_space<vmem>>, vector<8x128xf32>
    %cst_152 = arith.constant dense<0.000000e+00> : vector<8x128xf32>
    %529 = tpu.matmul %522, %283, %cst_152 {dimension_numbers = #tpu.dot_dimension_numbers<[1], [0], [0], [1], [0, 0, 1, 1], [], []>} : vector<8x32xf32>, vector<32x128xf32>, vector<8x128xf32> -> vector<8x128xf32>
    %530 = arith.addf %528, %529 : vector<8x128xf32>
    %531 = vector.extract_strided_slice %530 {offsets = [0, 0], sizes = [8, 32], strides = [1, 1]} : vector<8x128xf32> to vector<8x32xf32>
    %532 = arith.negf %531 : vector<8x32xf32>
    %533 = math.exp %532 : vector<8x32xf32>
    %cst_153 = arith.constant 1.000000e+00 : f32
    %534 = vector.broadcast %cst_153 : f32 to vector<8x32xf32>
    %535 = arith.addf %534, %533 : vector<8x32xf32>
    %536 = arith.divf %534, %535 : vector<8x32xf32>
    %537 = vector.extract_strided_slice %530 {offsets = [0, 32], sizes = [8, 32], strides = [1, 1]} : vector<8x128xf32> to vector<8x32xf32>
    %538 = arith.negf %537 : vector<8x32xf32>
    %539 = math.exp %538 : vector<8x32xf32>
    %cst_154 = arith.constant 1.000000e+00 : f32
    %540 = vector.broadcast %cst_154 : f32 to vector<8x32xf32>
    %541 = arith.addf %540, %539 : vector<8x32xf32>
    %542 = arith.divf %540, %541 : vector<8x32xf32>
    %543 = vector.extract_strided_slice %530 {offsets = [0, 64], sizes = [8, 32], strides = [1, 1]} : vector<8x128xf32> to vector<8x32xf32>
    %544 = math.tanh %543 : vector<8x32xf32>
    %545 = vector.extract_strided_slice %530 {offsets = [0, 96], sizes = [8, 32], strides = [1, 1]} : vector<8x128xf32> to vector<8x32xf32>
    %546 = arith.negf %545 : vector<8x32xf32>
    %547 = math.exp %546 : vector<8x32xf32>
    %cst_155 = arith.constant 1.000000e+00 : f32
    %548 = vector.broadcast %cst_155 : f32 to vector<8x32xf32>
    %549 = arith.addf %548, %547 : vector<8x32xf32>
    %550 = arith.divf %548, %549 : vector<8x32xf32>
    %551 = arith.mulf %542, %520 : vector<8x32xf32>
    %552 = arith.mulf %536, %544 : vector<8x32xf32>
    %553 = arith.addf %551, %552 : vector<8x32xf32>
    %554 = math.tanh %553 : vector<8x32xf32>
    %555 = arith.mulf %550, %554 : vector<8x32xf32>
    %556 = arith.index_cast %526 : i32 to index
    %c0_156 = arith.constant 0 : index
    %557 = vector.load %arg14[%556, %c0_156] : memref<64x32xf32, #tpu.memory_space<vmem>>, vector<8x32xf32>
    tpu.vector_store %arg14[%556, %c0_156], %555 {strides = array<i32>} : memref<64x32xf32, #tpu.memory_space<vmem>>, vector<8x32xf32>,
    %c8_i32_157 = arith.constant 8 : i32
    %c1_158 = arith.constant 1 : index
    %c0_159 = arith.constant 0 : index
    %c0_160 = arith.constant 0 : index
    %558 = vector.load %arg12[%c1_158, %c0_159, %c0_160] : memref<2x8x32xf32, #tpu.memory_space<vmem>>, vector<1x8x32xf32>
    %559 = vector.shape_cast %558 : vector<1x8x32xf32> to vector<8x32xf32>
    %560 = vector.shape_cast %555 : vector<8x32xf32> to vector<1x8x32xf32>
    tpu.vector_store %arg12[%c1_158, %c0_159, %c0_160], %560 {strides = array<i32>} : memref<2x8x32xf32, #tpu.memory_space<vmem>>, vector<1x8x32xf32>,
    %c1_161 = arith.constant 1 : index
    %c0_162 = arith.constant 0 : index
    %c0_163 = arith.constant 0 : index
    %561 = vector.load %arg13[%c1_161, %c0_162, %c0_163] : memref<2x8x32xf32, #tpu.memory_space<vmem>>, vector<1x8x32xf32>
    %562 = vector.shape_cast %561 : vector<1x8x32xf32> to vector<8x32xf32>
    %563 = vector.shape_cast %553 : vector<8x32xf32> to vector<1x8x32xf32>
    tpu.vector_store %arg13[%c1_161, %c0_162, %c0_163], %563 {strides = array<i32>} : memref<2x8x32xf32, #tpu.memory_space<vmem>>, vector<1x8x32xf32>,
    %c0_164 = arith.constant 0 : index
    %c0_165 = arith.constant 0 : index
    %564 = vector.load %arg9[%c0_164, %c0_165] : memref<1x32xf32, #tpu.memory_space<vmem>>, vector<1x32xf32>
    %cst_166 = arith.constant dense<0.000000e+00> : vector<1x8xf32>
    %565 = tpu.matmul %564, %555, %cst_166 {dimension_numbers = #tpu.dot_dimension_numbers<[1], [1], [0], [0], [0, 0, 1, 0], [], []>} : vector<1x32xf32>, vector<8x32xf32>, vector<1x8xf32> -> vector<1x8xf32>
    %c0_167 = arith.constant 0 : index
    %c0_168 = arith.constant 0 : index
    %566 = vector.load %arg10[%c0_167, %c0_168] : memref<1x1xf32, #tpu.memory_space<vmem>>, vector<1x1xf32>
    %567 = vector.broadcast %566 : vector<1x1xf32> to vector<1x8xf32>
    %568 = arith.addf %565, %567 : vector<1x8xf32>
    %569 = arith.negf %568 : vector<1x8xf32>
    %570 = math.exp %569 : vector<1x8xf32>
    %cst_169 = arith.constant 1.000000e+00 : f32
    %571 = vector.broadcast %cst_169 : f32 to vector<1x8xf32>
    %572 = arith.addf %571, %570 : vector<1x8xf32>
    %573 = arith.divf %571, %572 : vector<1x8xf32>
    %c0_170 = arith.constant 0 : index
    %c0_171 = arith.constant 0 : index
    %574 = vector.load %arg11[%c0_170, %c0_171] : memref<1x8xf32, #tpu.memory_space<vmem>>, vector<1x8xf32>
    tpu.vector_store %arg11[%c0_170, %c0_171], %573 {strides = array<i32>} : memref<1x8xf32, #tpu.memory_space<vmem>>, vector<1x8xf32>,
    return
  }
}

</mosaic_0001>

<bundles_post_ra>
// kernel: sentiment_rnn_forward.1
= control target key start
LH: loop header
LB: loop body
LE: loop exit
PB: predicated region body
PF: predicated region fallthrough
CT: control target
= control target key end

     0   :  { %vm64_vm0 = vcmask 130048   ;;  %v2787_v0 = vmov 0.0|0.0   ;;  %vm2788_vm1 = vmmov 0   ;;  %v2789_v4 = vmov 0.0   ;;  %s2790_s26 = smov 64   ;;  %s2791_s29 = smov 32   ;;  %s3257_s3 = inlined_call_operand.vmem [shape: f32[16,128], index: 3, kind: input, shape index: {}]   ;;  %s3258_s4 = inlined_call_operand.vmem [shape: f32[32,128], index: 4, kind: input, shape index: {}]   ;;  %s3259_s0 = inlined_call_operand.vmem [shape: f32[64,16], index: 0, kind: input, shape index: {}]   ;;  %s3260_s1 = inlined_call_operand.vmem [shape: f32[2,8,32], index: 1, kind: input, shape index: {}]   ;;  %s3261_s5 = inlined_call_operand.vmem [shape: f32[1,128], index: 5, kind: input, shape index: {}]   ;;  %s3262_s2 = inlined_call_operand.vmem [shape: f32[2,8,32], index: 2, kind: input, shape index: {}]   ;;  %s3263_s6 = inlined_call_operand.vmem [shape: f32[32,128], index: 6, kind: input, shape index: {}]   ;;  %s3264_s7 = inlined_call_operand.vmem [shape: f32[32,128], index: 7, kind: input, shape index: {}]   ;;  %s3265_s8 = inlined_call_operand.vmem [shape: f32[1,128], index: 8, kind: input, shape index: {}]   ;;  %s3266_s12 = inlined_call_operand.vmem [shape: f32[2,8,32], index: 12, kind: output, shape index: {1}]   ;;  %s3267_s10 = inlined_call_operand.<no memory space> [shape: f32[1,1], index: 10, kind: input, shape index: {}]   ;;  %s3268_s9 = inlined_call_operand.vmem [shape: f32[1,32], index: 9, kind: input, shape index: {}]   ;;  %s3269_s13 = inlined_call_operand.vmem [shape: f32[2,8,32], index: 13, kind: output, shape index: {2}]   ;;  %s3270_s11 = inlined_call_operand.vmem [shape: f32[1,8], index: 11, kind: output, shape index: {0}]  }
   0x1   :  { %2543 = vmatprep.subr.bf16.mxu1 %v2787_v0  ;;  %v43_v1 = vld [vmem:[%s3257_s3] sm:$0xff]  ;;  %v44_v2 = vld [vmem:[%s3257_s3 + $0x8] sm:$0xff]  ;;  %2346 = vmatprep.mubr.msk.f32.mxu1 %vm2788_vm1, %v2789_v4  ;;  %v47_v9 = vld [vmem:[%s3258_s4 + $0x10] sm:$0xff]  ;;  %vm205_vm2 = vcmask 261120   ;;  %vm2147_vm3 = vcmask 57344  }
   0x2   :  { %v45_v3 = vld [vmem:[%s3258_s4] sm:$0xff]  ;;  %v2539_v5 = vpack.c.bf16 %v44_v2, %v43_v1  ;;  %v46_v6 = vld [vmem:[%s3258_s4 + $0x8] sm:$0xff]  ;;  %v48_v10 = vld [vmem:[%s3258_s4 + $0x18] sm:$0xff]  ;;  %s2793_s4 = smov 96  }
   0x3   :  { %v50_v7 = vld [vmem:[%s3259_s0] sm:$0xff]  ;;  %v2882_v8 = vpack.c.bf16 %v46_v6, %v45_v3  ;;  %v51_v11 = vld [vmem:[%s3259_s0 + $0x8] sm:$0xff]  ;;  %v2895_v12 = vpack.c.bf16 %v48_v10, %v47_v9  ;;  %v52_v51 = vld [vmem:[%s3259_s0 + $0x10] sm:$0xff] }
   0x4   :  { %2326 = vmatprep.mubr.msk.f32.mxu0 %vm64_vm0, %v50_v7  ;;  %2540 = vmatprep.subr.bf16.mxu0 %v2539_v5  ;;  %v202_v13 = vld [vmem:[%s3260_s1] sm:$0xff]  ;;  %v53_v52 = vld [vmem:[%s3259_s0 + $0x18] sm:$0xff]  ;;  %v55_v54 = vld [vmem:[%s3259_s0 + $0x28] sm:$0xff] }
   0x5   :  { %2545 = vmatpush3.bf16.msra.mxu1 %v2882_v8  ;;  %2542 = vmatpush3.bf16.msra.mxu0 %v2539_v5  ;;  %v2919_v14 = vld [vmem:[%s3261_s5] ss:$0 sm:$0xff]  ;;  %v56_v55 = vld [vmem:[%s3259_s0 + $0x30] sm:$0xff]  ;;  %v57_v56 = vld [vmem:[%s3259_s0 + $0x38] sm:$0xff] }
   0x6   :  { %2546 = vmatprep.subr.bf16.mxu1 %v2787_v0  ;;  %2555 = vmatprep.subr.bf16.mxu0 %v2787_v0  ;;  %v203_v22 = vld [vmem:[%s3262_s2] sm:$0xff] }
   0x7   :  { %v54_v53 = vld [vmem:[%s3259_s0 + $0x20] sm:$0xff] }
   0x8   :  { %2327 = vmatmul.mubr.msk.f32.vlgmr.msra.gmra.mrb[0].mxu0 %vm64_vm0, %v51_v11 }
   0x9   :  { %2548 = vmatpush3.bf16.msra.mxu1 %v2895_v12  ;;  %2557 = vmatpush3.bf16.msra.mxu0 %v2882_v8 }
   0xa   :  { %2549 = vmatprep.subr.bf16.mxu1 %v2787_v0  ;;  %2558 = vmatprep.subr.bf16.mxu0 %v2787_v0 }
   0xb   :  { %2329 = vmatprep.mubr.msk.f32.mxu0 %vm64_vm0, %v52_v51 }
   0xc   :  { %2347 = vmatmul.mubr.msk.f32.vlgmr.msra.gmra.mrb[0].mxu1 %vm205_vm2, %v202_v13  ;;  %2330 = vmatmul.mubr.msk.f32.gmra.mrb[2].mxu0 %vm64_vm0, %v53_v52 }
   0xd   :  { %2551 = vmatpush3.bf16.msra.mxu1 %v2882_v8  ;;  %2357 = vmatprep.mubr.msk.f32.mxu1 %vm2788_vm1, %v2789_v4 }
   0xe   :  { %2552 = vmatprep.subr.bf16.mxu1 %v2787_v0  ;;  %2560 = vmatpush3.bf16.msra.mxu0 %v2895_v12 }
   0xf   :  { %2567 = vmatprep.subr.bf16.mxu0 %v2787_v0  ;;  %2332 = vmatprep.mubr.msk.f32.mxu0 %vm64_vm0, %v54_v53 }
  0x10   :  { %2333 = vmatmul.mubr.msk.f32.gmra.mrb[4].mxu0 %vm64_vm0, %v55_v54 }
  0x11   :  { %2554 = vmatpush3.bf16.msra.mxu1 %v2895_v12  ;;  %2335 = vmatprep.mubr.msk.f32.mxu0 %vm64_vm0, %v56_v55 }
  0x12   :  { %2561 = vmatprep.subr.bf16.mxu1 %v2787_v0 }
  0x14   :  { %2336 = vmatmul.mubr.msk.f32.gmra.mrb[6].mxu0 %vm64_vm0, %v57_v56 }
  0x15   :  { %2368 = vmatprep.mubr.msk.f32.mxu0 %vm2788_vm1, %v2789_v4 }
  0xdb   :  { %v2328_v15 = vpop.f32.mrb[0].mxu0 }
  0xdc   :  { %v155_v16 = vpop.f32.mrb[1].mxu0  ;;  %v161_v37 = vadd.f32 %v2328_v15, %v2919_v14 }
  0xdd   :  { %v156_v17 = vadd.f32 %v2919_v14, %v155_v16 }
  0xdf   :  { %v275_v18 = vpop.f32.mrb[0].mxu1  ;;  %v2331_v60 = vpop.f32.mrb[2].mxu0 }
  0xe0   :  { %v279_v19 = vadd.f32 %v275_v18, %v156_v17  ;;  %v2348_v20 = vpop.f32.mrb[1].mxu1  ;;  %v165_v61 = vpop.f32.mrb[3].mxu0 }
  0xe1   :  { %v166_v5 = vadd.f32 %v2919_v14, %v165_v61 }
  0xe2   :  { %2655 = vtanh.f32 %v279_v19  ;;  %v2171_v23 = vmul.f32 -1.442695, %v279_v19 }
  0xe3   :  { %v2969_v62 = vpop.f32.mrb[4].mxu0 }
  0xe4   :  { %2657 = vpow2.f32 %v2171_v23  ;;  %v2971_v63 = vpop.f32.mrb[5].mxu0 }
  0xe7   :  { %v2973_v1 = vpop.f32.mrb[6].mxu0 }
  0xe8   :  { %v2975_v2 = vpop.f32.mrb[7].mxu0 }
  0xec   :  { %v2656_v21 = vpop.eup %2655 }
  0xed   :  { %293 = vrot.lane.b32.xlu0 %v2656_v21, %s2790_s26 }
  0xee   :  { %v2658_v24 = vpop.eup %2657 }
  0xef   :  { %v283_v25 = vadd.f32 1.0, %v2658_v24 }
  0xf1   :  { %288 = vrot.lane.b32.xlu0 %v203_v22, %s2791_s29  ;;  %2659 = vrcp.f32 %v283_v25 }
  0xfb   :  { %v2660_v26 = vpop.eup %2659 }
 0x15f   :  { %v294_v27 = vpop.permute.xlu0 %293 }
 0x160   :  { %v296_v28 = vmul.f32 %v2660_v26, %v294_v27 }
 0x162   :  { %298 = vrot.lane.b32.xlu1 %v296_v28, %s2791_s29 }
 0x163   :  { %v289_v29 = vpop.permute.xlu0 %288 }
 0x164   :  { %v291_v30 = vmul.f32 %v2660_v26, %v289_v29 }
 0x1d4   :  { %v299_v31 = vpop.permute.xlu1 %298 }
 0x1d5   :  { %v301_v32 = vadd.f32 %v299_v31, %v291_v30 }
 0x1d7   :  { %2661 = vtanh.f32 %v301_v32 }
 0x1e1   :  { %v2662_v33 = vpop.eup %2661 }
 0x1e2   :  { %304 = vrot.lane.b32.xlu1 %v2662_v33, %s2790_s26 }
 0x254   :  { %v305_v34 = vpop.permute.xlu1 %304 }
 0x255   :  { %v307_v35 = vmul.f32 %v2660_v26, %v305_v34  ;;  %v171_v26 = vadd.f32 %v2331_v60, %v2919_v14 }
 0x257   :  { %309 = vrot.lane.b32.xlu0 %v307_v35, %s2791_s29 }
 0x2c9   :  { %v310_v36 = vpop.permute.xlu0 %309 }
 0x2ca   :  { %312 = vst.msk [vmem:[#allocation2] sm:$0xff] %vm205_vm2, %v310_v36  ;;  %2358 = vmatmul.mubr.msk.f32.vlgmr.msra.gmra.mrb[2].mxu1 %vm205_vm2, %v310_v36 }
 0x2cb   :  { %2563 = vmatpush3.bf16.msra.mxu1 %v2882_v8  ;;  %2379 = vmatprep.mubr.msk.f32.mxu1 %vm2788_vm1, %v2789_v4 }
 0x2cc   :  { %2564 = vmatprep.subr.bf16.mxu1 %v2787_v0 }
 0x2cf   :  { %2566 = vmatpush3.bf16.msra.mxu1 %v2895_v12 }
 0x2d0   :  { %2573 = vmatprep.subr.bf16.mxu1 %v2787_v0 }
 0x39d   :  { %v383_v38 = vpop.f32.mrb[2].mxu1 }
 0x39e   :  { %v387_v39 = vadd.f32 %v383_v38, %v161_v37  ;;  %v2359_v40 = vpop.f32.mrb[3].mxu1 }
 0x3a0   :  { %2663 = vtanh.f32 %v387_v39  ;;  %v2173_v42 = vmul.f32 -1.442695, %v387_v39 }
 0x3a2   :  { %2665 = vpow2.f32 %v2173_v42 }
 0x3aa   :  { %v2664_v41 = vpop.eup %2663 }
 0x3ab   :  { %397 = vrot.lane.b32.xlu1 %v2664_v41, %s2790_s26 }
 0x3ac   :  { %v2666_v43 = vpop.eup %2665 }
 0x3ad   :  { %v391_v44 = vadd.f32 1.0, %v2666_v43 }
 0x3af   :  { %2667 = vrcp.f32 %v391_v44  ;;  %v176_v44 = vadd.f32 %v2919_v14, %v2971_v63  ;;  %v181_v63 = vadd.f32 %v2969_v62, %v2919_v14 }
 0x3b9   :  { %v2668_v45 = vpop.eup %2667 }
 0x3ba   :  { %v395_v48 = vmul.f32 %v2668_v45, %v301_v32 }
 0x41d   :  { %v398_v46 = vpop.permute.xlu1 %397 }
 0x41e   :  { %v400_v47 = vmul.f32 %v2668_v45, %v398_v46 }
 0x420   :  { %402 = vrot.lane.b32.xlu0 %v400_v47, %s2791_s29 }
 0x492   :  { %v403_v49 = vpop.permute.xlu0 %402 }
 0x493   :  { %v405_v50 = vadd.f32 %v403_v49, %v395_v48 }
 0x495   :  { %2669 = vtanh.f32 %v405_v50 }
 0x49f   :  { %v2670_v57 = vpop.eup %2669 }
 0x4a0   :  { %408 = vrot.lane.b32.xlu1 %v2670_v57, %s2790_s26 }
 0x512   :  { %v409_v58 = vpop.permute.xlu1 %408 }
 0x513   :  { %v411_v59 = vmul.f32 %v2668_v45, %v409_v58 }
 0x515   :  { %413 = vrot.lane.b32.xlu0 %v411_v59, %s2791_s29 }
 0x587   :  { %v414_v3 = vpop.permute.xlu0 %413 }
 0x588   :  { %417 = vst.msk [vmem:[#allocation2 + $0x8] sm:$0xff] %vm205_vm2, %v414_v3  ;;  %2369 = vmatmul.mubr.msk.f32.vlgmr.msra.gmra.mrb[8].mxu0 %vm205_vm2, %v414_v3 }
 0x589   :  { %2569 = vmatpush3.bf16.msra.mxu0 %v2882_v8  ;;  %2390 = vmatprep.mubr.msk.f32.mxu0 %vm2788_vm1, %v2789_v4 }
 0x58a   :  { %2570 = vmatprep.subr.bf16.mxu0 %v2787_v0 }
 0x58d   :  { %2572 = vmatpush3.bf16.msra.mxu0 %v2895_v12 }
 0x58e   :  { %2579 = vmatprep.subr.bf16.mxu0 %v2787_v0 }
 0x65b   :  { %v488_v6 = vpop.f32.mrb[8].mxu0 }
 0x65c   :  { %v492_v7 = vadd.f32 %v488_v6, %v166_v5  ;;  %v2370_v9 = vpop.f32.mrb[9].mxu0 }
 0x65e   :  { %2671 = vtanh.f32 %v492_v7  ;;  %v2175_v11 = vmul.f32 -1.442695, %v492_v7 }
 0x660   :  { %2673 = vpow2.f32 %v2175_v11 }
 0x668   :  { %v2672_v10 = vpop.eup %2671 }
 0x669   :  { %502 = vrot.lane.b32.xlu1 %v2672_v10, %s2790_s26 }
 0x66a   :  { %v2674_v13 = vpop.eup %2673 }
 0x66b   :  { %v496_v15 = vadd.f32 1.0, %v2674_v13 }
 0x66d   :  { %2675 = vrcp.f32 %v496_v15 }
 0x677   :  { %v2676_v16 = vpop.eup %2675 }
 0x678   :  { %v500_v19 = vmul.f32 %v2676_v16, %v405_v50 }
 0x6db   :  { %v503_v17 = vpop.permute.xlu1 %502 }
 0x6dc   :  { %v505_v18 = vmul.f32 %v2676_v16, %v503_v17  ;;  %v1054_v17 = vld [vmem:[%s3263_s6] sm:$0xff] }
 0x6de   :  { %507 = vrot.lane.b32.xlu0 %v505_v18, %s2791_s29  ;;  %v1055_v18 = vld [vmem:[%s3263_s6 + $0x8] sm:$0xff] }
 0x750   :  { %v508_v20 = vpop.permute.xlu0 %507 }
 0x751   :  { %v510_v21 = vadd.f32 %v508_v20, %v500_v19  ;;  %v2591_v19 = vpack.c.bf16 %v1055_v18, %v1054_v17 }
 0x753   :  { %2677 = vtanh.f32 %v510_v21 }
 0x75d   :  { %v2678_v22 = vpop.eup %2677 }
 0x75e   :  { %513 = vrot.lane.b32.xlu1 %v2678_v22, %s2790_s26 }
 0x7d0   :  { %v514_v23 = vpop.permute.xlu1 %513 }
 0x7d1   :  { %v516_v24 = vmul.f32 %v2676_v16, %v514_v23  ;;  %v1056_v23 = vld [vmem:[%s3263_s6 + $0x10] sm:$0xff] }
 0x7d3   :  { %518 = vrot.lane.b32.xlu0 %v516_v24, %s2791_s29  ;;  %v1057_v24 = vld [vmem:[%s3263_s6 + $0x18] sm:$0xff] }
 0x845   :  { %v519_v25 = vpop.permute.xlu0 %518 }
 0x846   :  { %522 = vst.msk [vmem:[#allocation2 + $0x10] sm:$0xff] %vm205_vm2, %v519_v25  ;;  %2380 = vmatmul.mubr.msk.f32.vlgmr.msra.gmra.mrb[4].mxu1 %vm205_vm2, %v519_v25  ;;  %v2595_v25 = vpack.c.bf16 %v1057_v24, %v1056_v23 }
 0x847   :  { %2575 = vmatpush3.bf16.msra.mxu1 %v2882_v8  ;;  %2401 = vmatprep.mubr.msk.f32.mxu1 %vm2788_vm1, %v2789_v4 }
 0x848   :  { %2576 = vmatprep.subr.bf16.mxu1 %v2787_v0 }
 0x84b   :  { %2578 = vmatpush3.bf16.msra.mxu1 %v2895_v12 }
 0x84c   :  { %2585 = vmatprep.subr.bf16.mxu1 %v2787_v0 }
 0x919   :  { %v593_v27 = vpop.f32.mrb[4].mxu1 }
 0x91a   :  { %v597_v28 = vadd.f32 %v593_v27, %v171_v26  ;;  %v2381_v29 = vpop.f32.mrb[5].mxu1  ;;  %v1063_v27 = vld [vmem:[#allocation2] sm:$0xff] }
 0x91b   :  { %v1065_v29 = vld [vmem:[#allocation2 + $0x10] sm:$0xff] }
 0x91c   :  { %2679 = vtanh.f32 %v597_v28  ;;  %v2177_v31 = vmul.f32 -1.442695, %v597_v28  ;;  %v1064_v28 = vld [vmem:[#allocation2 + $0x8] sm:$0xff] }
 0x91e   :  { %2681 = vpow2.f32 %v2177_v31 }
 0x926   :  { %v2680_v30 = vpop.eup %2679 }
 0x927   :  { %607 = vrot.lane.b32.xlu1 %v2680_v30, %s2790_s26 }
 0x928   :  { %v2682_v32 = vpop.eup %2681 }
 0x929   :  { %v601_v33 = vadd.f32 1.0, %v2682_v32 }
 0x92b   :  { %2683 = vrcp.f32 %v601_v33  ;;  %v186_v33 = vadd.f32 %v2919_v14, %v2975_v2 }
 0x935   :  { %v2684_v34 = vpop.eup %2683 }
 0x936   :  { %v605_v37 = vmul.f32 %v2684_v34, %v510_v21 }
 0x999   :  { %v608_v35 = vpop.permute.xlu1 %607 }
 0x99a   :  { %v610_v36 = vmul.f32 %v2684_v34, %v608_v35 }
 0x99c   :  { %612 = vrot.lane.b32.xlu0 %v610_v36, %s2791_s29 }
 0xa0e   :  { %v613_v38 = vpop.permute.xlu0 %612 }
 0xa0f   :  { %v615_v39 = vadd.f32 %v613_v38, %v605_v37 }
 0xa11   :  { %2685 = vtanh.f32 %v615_v39 }
 0xa1b   :  { %v2686_v40 = vpop.eup %2685 }
 0xa1c   :  { %618 = vrot.lane.b32.xlu1 %v2686_v40, %s2790_s26 }
 0xa8e   :  { %v619_v41 = vpop.permute.xlu1 %618 }
 0xa8f   :  { %v621_v42 = vmul.f32 %v2684_v34, %v619_v41 }
 0xa91   :  { %623 = vrot.lane.b32.xlu0 %v621_v42, %s2791_s29 }
 0xb03   :  { %v624_v43 = vpop.permute.xlu0 %623 }
 0xb04   :  { %627 = vst.msk [vmem:[#allocation2 + $0x18] sm:$0xff] %vm205_vm2, %v624_v43  ;;  %2391 = vmatmul.mubr.msk.f32.vlgmr.msra.gmra.mrb[10].mxu0 %vm205_vm2, %v624_v43 }
 0xb05   :  { %2581 = vmatpush3.bf16.msra.mxu0 %v2882_v8  ;;  %2412 = vmatprep.mubr.msk.f32.mxu0 %vm2788_vm1, %v2789_v4 }
 0xb06   :  { %2582 = vmatprep.subr.bf16.mxu0 %v2787_v0 }
 0xb09   :  { %2584 = vmatpush3.bf16.msra.mxu0 %v2895_v12 }
 0xb0a   :  { %2592 = vmatprep.subr.bf16.mxu0 %v2591_v19 }
 0xb0b   :  { %v1066_v30 = vld [vmem:[#allocation2 + $0x18] sm:$0xff] }
 0xbd7   :  { %v698_v45 = vpop.f32.mrb[10].mxu0 }
 0xbd8   :  { %v702_v46 = vadd.f32 %v698_v45, %v176_v44  ;;  %v2392_v47 = vpop.f32.mrb[11].mxu0 }
 0xbda   :  { %2687 = vtanh.f32 %v702_v46  ;;  %v2179_v49 = vmul.f32 -1.442695, %v702_v46 }
 0xbdc   :  { %2689 = vpow2.f32 %v2179_v49 }
 0xbe4   :  { %v2688_v48 = vpop.eup %2687 }
 0xbe5   :  { %712 = vrot.lane.b32.xlu1 %v2688_v48, %s2790_s26 }
 0xbe6   :  { %v2690_v50 = vpop.eup %2689 }
 0xbe7   :  { %v706_v51 = vadd.f32 1.0, %v2690_v50 }
 0xbe9   :  { %2691 = vrcp.f32 %v706_v51 }
 0xbf3   :  { %v2692_v52 = vpop.eup %2691 }
 0xbf4   :  { %v710_v55 = vmul.f32 %v2692_v52, %v615_v39 }
 0xc57   :  { %v713_v53 = vpop.permute.xlu1 %712 }
 0xc58   :  { %v715_v54 = vmul.f32 %v2692_v52, %v713_v53  ;;  %v1058_v53 = vld [vmem:[%s3264_s7] sm:$0xff] }
 0xc5a   :  { %717 = vrot.lane.b32.xlu0 %v715_v54, %s2791_s29  ;;  %v1059_v54 = vld [vmem:[%s3264_s7 + $0x8] sm:$0xff] }
 0xccc   :  { %v718_v56 = vpop.permute.xlu0 %717 }
 0xccd   :  { %v720_v57 = vadd.f32 %v718_v56, %v710_v55  ;;  %v3075_v55 = vpack.c.bf16 %v1059_v54, %v1058_v53  ;;  %v1060_v56 = vld [vmem:[%s3264_s7 + $0x10] sm:$0xff] }
 0xccf   :  { %2693 = vtanh.f32 %v720_v57 }
 0xcd9   :  { %v2694_v58 = vpop.eup %2693 }
 0xcda   :  { %723 = vrot.lane.b32.xlu1 %v2694_v58, %s2790_s26 }
 0xd4c   :  { %v724_v59 = vpop.permute.xlu1 %723 }
 0xd4d   :  { %v726_v60 = vmul.f32 %v2692_v52, %v724_v59 }
 0xd4f   :  { %728 = vrot.lane.b32.xlu0 %v726_v60, %s2791_s29 }
 0xdc1   :  { %v729_v61 = vpop.permute.xlu0 %728 }
 0xdc2   :  { %732 = vst.msk [vmem:[#allocation2 + $0x20] sm:$0xff] %vm205_vm2, %v729_v61  ;;  %2402 = vmatmul.mubr.msk.f32.vlgmr.msra.gmra.mrb[6].mxu1 %vm205_vm2, %v729_v61  ;;  %v2196_v61 = vld [vmem:[%s3262_s2 + $0x8] sm:$0xff] }
 0xdc3   :  { %2587 = vmatpush3.bf16.msra.mxu1 %v2882_v8  ;;  %2423 = vmatprep.mubr.msk.f32.mxu1 %vm2788_vm1, %v2789_v4 }
 0xdc4   :  { %2588 = vmatprep.subr.bf16.mxu1 %v2787_v0 }
 0xdc7   :  { %2590 = vmatpush3.bf16.msra.mxu1 %v2895_v12 }
 0xdc8   :  { %2599 = vmatprep.subr.bf16.mxu1 %v2787_v0 }
 0xdc9   :  { %v1067_v31 = vld [vmem:[#allocation2 + $0x20] sm:$0xff] }
 0xe95   :  { %v803_v3 = vpop.f32.mrb[6].mxu1 }
 0xe96   :  { %v807_v5 = vadd.f32 %v803_v3, %v181_v63  ;;  %v2403_v6 = vpop.f32.mrb[7].mxu1  ;;  %v2195_v3 = vld [vmem:[%s3260_s1 + $0x8] sm:$0xff] }
 0xe97   :  { %v191_v6 = vadd.f32 %v2973_v1, %v2919_v14 }
 0xe98   :  { %2695 = vtanh.f32 %v807_v5  ;;  %v2181_v8 = vmul.f32 -1.442695, %v807_v5 }
 0xe9a   :  { %2697 = vpow2.f32 %v2181_v8 }
 0xea2   :  { %v2696_v7 = vpop.eup %2695 }
 0xea3   :  { %817 = vrot.lane.b32.xlu1 %v2696_v7, %s2790_s26 }
 0xea4   :  { %v2698_v9 = vpop.eup %2697 }
 0xea5   :  { %v811_v10 = vadd.f32 1.0, %v2698_v9 }
 0xea7   :  { %2699 = vrcp.f32 %v811_v10  ;;  %v3118_v10 = vld [vmem:[%s3265_s8] ss:$0 sm:$0xff] }
 0xeb1   :  { %v2700_v11 = vpop.eup %2699 }
 0xeb2   :  { %v815_v15 = vmul.f32 %v2700_v11, %v720_v57  ;;  %v1061_v57 = vld [vmem:[%s3264_s7 + $0x18] sm:$0xff] }
 0xeb3   :  { %v3085_v58 = vpack.c.bf16 %v1061_v57, %v1060_v56 }
 0xf15   :  { %v818_v13 = vpop.permute.xlu1 %817 }
 0xf16   :  { %v820_v12 = vmul.f32 %v2700_v11, %v818_v13 }
 0xf18   :  { %822 = vrot.lane.b32.xlu0 %v820_v12, %s2791_s29 }
 0xf8a   :  { %v823_v16 = vpop.permute.xlu0 %822 }
 0xf8b   :  { %v825_v62 = vadd.f32 %v823_v16, %v815_v15 }
 0xf8d   :  { %2701 = vtanh.f32 %v825_v62 }
 0xf97   :  { %v2702_v20 = vpop.eup %2701 }
 0xf98   :  { %828 = vrot.lane.b32.xlu1 %v2702_v20, %s2790_s26 }
0x100a   :  { %v829_v21 = vpop.permute.xlu1 %828 }
0x100b   :  { %v831_v22 = vmul.f32 %v2700_v11, %v829_v21 }
0x100d   :  { %833 = vrot.lane.b32.xlu0 %v831_v22, %s2791_s29 }
0x107f   :  { %v834_v26 = vpop.permute.xlu0 %833 }
0x1080   :  { %837 = vst.msk [vmem:[#allocation2 + $0x28] sm:$0xff] %vm205_vm2, %v834_v26  ;;  %2413 = vmatmul.mubr.msk.f32.vlgmr.msra.gmra.mrb[12].mxu0 %vm205_vm2, %v834_v26 }
0x1081   :  { %2594 = vmatpush3.bf16.msra.mxu0 %v2591_v19  ;;  %2434 = vmatprep.mubr.msk.f32.mxu0 %vm205_vm2, %v1063_v27 }
0x1082   :  { %2596 = vmatprep.subr.bf16.mxu0 %v2595_v25 }
0x1085   :  { %2598 = vmatpush3.bf16.msra.mxu0 %v2595_v25 }
0x1086   :  { %2611 = vmatprep.subr.bf16.mxu0 %v2787_v0 }
0x1087   :  { %v1068_v32 = vld [vmem:[#allocation2 + $0x28] sm:$0xff] }
0x1088   :  { %2435 = vmatmul.mubr.msk.f32.vlgmr.msra.gmra.mrb[14].mxu0 %vm205_vm2, %v1064_v28 }
0x1089   :  { %2437 = vmatprep.mubr.msk.f32.mxu0 %vm205_vm2, %v1065_v29  ;;  %2613 = vmatpush3.bf16.msra.mxu0 %v3075_v55 }
0x108a   :  { %2614 = vmatprep.subr.bf16.mxu0 %v2787_v0 }
0x108c   :  { %2438 = vmatmul.mubr.msk.f32.gmra.mrb[16].mxu0 %vm205_vm2, %v1066_v30 }
0x108d   :  { %2440 = vmatprep.mubr.msk.f32.mxu0 %vm205_vm2, %v1067_v31  ;;  %2616 = vmatpush3.bf16.msra.mxu0 %v3085_v58 }
0x108e   :  { %2623 = vmatprep.subr.bf16.mxu0 %v2787_v0 }
0x1090   :  { %2441 = vmatmul.mubr.msk.f32.gmra.mrb[18].mxu0 %vm205_vm2, %v1068_v32 }
0x1153   :  { %v908_v34 = vpop.f32.mrb[12].mxu0 }
0x1154   :  { %v912_v35 = vadd.f32 %v908_v34, %v186_v33  ;;  %v2414_v36 = vpop.f32.mrb[13].mxu0 }
0x1156   :  { %2703 = vtanh.f32 %v912_v35  ;;  %v2183_v44 = vmul.f32 -1.442695, %v912_v35 }
0x1158   :  { %2705 = vpow2.f32 %v2183_v44 }
0x115b   :  { %v3053_v37 = vpop.f32.mrb[14].mxu0 }
0x115c   :  { %v1167_v38 = vpop.f32.mrb[15].mxu0 }
0x115d   :  { %v1168_v11 = vadd.f32 %v3118_v10, %v1167_v38 }
0x115f   :  { %v3055_v39 = vpop.f32.mrb[16].mxu0 }
0x1160   :  { %v2704_v40 = vpop.eup %2703  ;;  %v3057_v41 = vpop.f32.mrb[17].mxu0 }
0x1161   :  { %922 = vrot.lane.b32.xlu1 %v2704_v40, %s2790_s26 }
0x1162   :  { %v2706_v2 = vpop.eup %2705 }
0x1163   :  { %v3060_v42 = vpop.f32.mrb[18].mxu0  ;;  %v916_v45 = vadd.f32 1.0, %v2706_v2 }
0x1164   :  { %v3062_v43 = vpop.f32.mrb[19].mxu0 }
0x1165   :  { %2707 = vrcp.f32 %v916_v45  ;;  %v1173_v45 = vadd.f32 %v3053_v37, %v3118_v10 }
0x116f   :  { %v2708_v46 = vpop.eup %2707 }
0x1170   :  { %v920_v49 = vmul.f32 %v2708_v46, %v825_v62 }
0x11d3   :  { %v923_v47 = vpop.permute.xlu1 %922 }
0x11d4   :  { %v925_v48 = vmul.f32 %v2708_v46, %v923_v47 }
0x11d6   :  { %927 = vrot.lane.b32.xlu0 %v925_v48, %s2791_s29 }
0x1248   :  { %v928_v50 = vpop.permute.xlu0 %927 }
0x1249   :  { %v3065_v51 = vadd.f32 %v928_v50, %v920_v49 }
0x124b   :  { %2709 = vtanh.f32 %v3065_v51 }
0x1255   :  { %v2710_v52 = vpop.eup %2709 }
0x1256   :  { %933 = vrot.lane.b32.xlu1 %v2710_v52, %s2790_s26 }
0x12c8   :  { %v934_v59 = vpop.permute.xlu1 %933 }
0x12c9   :  { %v936_v60 = vmul.f32 %v2708_v46, %v934_v59 }
0x12cb   :  { %938 = vrot.lane.b32.xlu0 %v936_v60, %s2791_s29 }
0x12cf   :  { %1301 = vrot.lane.b32.xlu0 %v2196_v61, %s2791_s29 }
0x133d   :  { %v939_v63 = vpop.permute.xlu0 %938 }
0x133e   :  { %942 = vst.msk [vmem:[#allocation2 + $0x30] sm:$0xff] %vm205_vm2, %v939_v63  ;;  %2424 = vmatmul.mubr.msk.f32.vlgmr.msra.gmra.mrb[8].mxu1 %vm205_vm2, %v939_v63 }
0x133f   :  { %2601 = vmatpush3.bf16.msra.mxu1 %v3075_v55  ;;  %2454 = vmatprep.mubr.msk.f32.mxu1 %vm2788_vm1, %v2789_v4 }
0x1340   :  { %2602 = vmatprep.subr.bf16.mxu1 %v2787_v0 }
0x1341   :  { %v1302_v20 = vpop.permute.xlu0 %1301 }
0x1343   :  { %2604 = vmatpush3.bf16.msra.mxu1 %v3085_v58 }
0x1344   :  { %2605 = vmatprep.subr.bf16.mxu1 %v2787_v0 }
0x1345   :  { %v1069_v5 = vld [vmem:[#allocation2 + $0x30] sm:$0xff] }
0x1346   :  { %2455 = vmatmul.mubr.msk.f32.vlgmr.msra.gmra.mrb[10].mxu1 %vm205_vm2, %v2195_v3  ;;  %2443 = vmatprep.mubr.msk.f32.mxu0 %vm205_vm2, %v1069_v5 }
0x1347   :  { %2607 = vmatpush3.bf16.msra.mxu1 %v3075_v55  ;;  %2465 = vmatprep.mubr.msk.f32.mxu1 %vm2788_vm1, %v2789_v4 }
0x1348   :  { %2608 = vmatprep.subr.bf16.mxu1 %v2787_v0 }
0x134b   :  { %2610 = vmatpush3.bf16.msra.mxu1 %v3085_v58 }
0x134c   :  { %2617 = vmatprep.subr.bf16.mxu1 %v2787_v0 }
0x1411   :  { %v1013_v7 = vpop.f32.mrb[8].mxu1 }
0x1412   :  { %v1017_v8 = vadd.f32 %v1013_v7, %v191_v6  ;;  %v2425_v9 = vpop.f32.mrb[9].mxu1 }
0x1413   :  { %v1178_v9 = vadd.f32 %v3118_v10, %v3057_v41 }
0x1414   :  { %v2185_v26 = vmul.f32 -1.442695, %v1017_v8 }
0x1419   :  { %v1288_v13 = vpop.f32.mrb[10].mxu1 }
0x141a   :  { %v1292_v12 = vadd.f32 %v1288_v13, %v1168_v11  ;;  %v2456_v15 = vpop.f32.mrb[11].mxu1 }
0x141c   :  { %2711 = vtanh.f32 %v1292_v12  ;;  %v2198_v62 = vmul.f32 -1.442695, %v1292_v12 }
0x141e   :  { %2713 = vpow2.f32 %v2198_v62 }
0x1426   :  { %v2712_v16 = vpop.eup %2711 }
0x1427   :  { %1306 = vrot.lane.b32.xlu1 %v2712_v16, %s2790_s26 }
0x1428   :  { %v2714_v14 = vpop.eup %2713 }
0x1429   :  { %v1296_v1 = vadd.f32 1.0, %v2714_v14 }
0x142b   :  { %2715 = vrcp.f32 %v1296_v1 }
0x1435   :  { %v2716_v17 = vpop.eup %2715 }
0x1436   :  { %v1304_v21 = vmul.f32 %v2716_v17, %v1302_v20 }
0x1499   :  { %v1307_v18 = vpop.permute.xlu1 %1306 }
0x149a   :  { %v1309_v19 = vmul.f32 %v2716_v17, %v1307_v18 }
0x149c   :  { %1311 = vrot.lane.b32.xlu1 %v1309_v19, %s2791_s29 }
0x150e   :  { %v1312_v22 = vpop.permute.xlu1 %1311 }
0x150f   :  { %v1314_v23 = vadd.f32 %v1312_v22, %v1304_v21 }
0x1511   :  { %2717 = vtanh.f32 %v1314_v23 }
0x1512   :  { %2719 = vtanh.f32 %v1017_v8 }
0x1513   :  { %2721 = vpow2.f32 %v2185_v26 }
0x151b   :  { %v2718_v24 = vpop.eup %2717 }
0x151c   :  { %1317 = vrot.lane.b32.xlu0 %v2718_v24, %s2790_s26  ;;  %v2720_v25 = vpop.eup %2719 }
0x151d   :  { %v2722_v27 = vpop.eup %2721 }
0x151e   :  { %v1021_v28 = vadd.f32 1.0, %v2722_v27 }
0x1520   :  { %1027 = vrot.lane.b32.xlu0 %v2720_v25, %s2790_s26  ;;  %2723 = vrcp.f32 %v1021_v28  ;;  %v1183_v25 = vadd.f32 %v3055_v39, %v3118_v10 }
0x152a   :  { %v2724_v31 = vpop.eup %2723 }
0x152b   :  { %v1025_v35 = vmul.f32 %v2724_v31, %v3065_v51 }
0x158e   :  { %v1318_v29 = vpop.permute.xlu0 %1317 }
0x158f   :  { %v1320_v30 = vmul.f32 %v2716_v17, %v1318_v29 }
0x1591   :  { %1322 = vrot.lane.b32.xlu1 %v1320_v30, %s2791_s29 }
0x1592   :  { %v1028_v32 = vpop.permute.xlu0 %1027 }
0x1593   :  { %v1030_v33 = vmul.f32 %v2724_v31, %v1028_v32 }
0x1595   :  { %1032 = vrot.lane.b32.xlu0 %v1030_v33, %s2791_s29 }
0x1603   :  { %v1323_v34 = vpop.permute.xlu1 %1322 }
0x1604   :  { %1325 = vst.msk [vmem:[#allocation2] sm:$0xff] %vm205_vm2, %v1323_v34  ;;  %2466 = vmatmul.mubr.msk.f32.vlgmr.msra.gmra.mrb[12].mxu1 %vm205_vm2, %v1323_v34 }
0x1605   :  { %2619 = vmatpush3.bf16.msra.mxu1 %v3075_v55  ;;  %2487 = vmatprep.mubr.msk.f32.mxu1 %vm2788_vm1, %v2789_v4 }
0x1606   :  { %2620 = vmatprep.subr.bf16.mxu1 %v2787_v0 }
0x1607   :  { %v1033_v36 = vpop.permute.xlu0 %1032 }
0x1608   :  { %v3134_v38 = vadd.f32 %v1033_v36, %v1025_v35 }
0x1609   :  { %2622 = vmatpush3.bf16.msra.mxu1 %v3085_v58 }
0x160a   :  { %2725 = vtanh.f32 %v3134_v38  ;;  %2629 = vmatprep.subr.bf16.mxu1 %v2787_v0 }
0x1614   :  { %v2726_v40 = vpop.eup %2725 }
0x1615   :  { %1038 = vrot.lane.b32.xlu0 %v2726_v40, %s2790_s26 }
0x1687   :  { %v1039_v44 = vpop.permute.xlu0 %1038 }
0x1688   :  { %v1041_v2 = vmul.f32 %v2724_v31, %v1039_v44 }
0x168a   :  { %1043 = vrot.lane.b32.xlu0 %v1041_v2, %s2791_s29 }
0x16d7   :  { %v1395_v46 = vpop.f32.mrb[12].mxu1 }
0x16d8   :  { %v1399_v47 = vadd.f32 %v1395_v46, %v1173_v45  ;;  %v2467_v48 = vpop.f32.mrb[13].mxu1 }
0x16da   :  { %2727 = vtanh.f32 %v1399_v47  ;;  %v2200_v37 = vmul.f32 -1.442695, %v1399_v47  ;;  %v1188_v47 = vadd.f32 %v3118_v10, %v3062_v43 }
0x16dc   :  { %2729 = vpow2.f32 %v2200_v37 }
0x16e4   :  { %v2728_v49 = vpop.eup %2727 }
0x16e5   :  { %1409 = vrot.lane.b32.xlu1 %v2728_v49, %s2790_s26 }
0x16e6   :  { %v2730_v52 = vpop.eup %2729 }
0x16e7   :  { %v1403_v53 = vadd.f32 1.0, %v2730_v52 }
0x16e9   :  { %2731 = vrcp.f32 %v1403_v53 }
0x16f3   :  { %v2732_v54 = vpop.eup %2731 }
0x16f4   :  { %v1407_v59 = vmul.f32 %v2732_v54, %v1314_v23 }
0x16fc   :  { %v1044_v50 = vpop.permute.xlu0 %1043 }
0x16fd   :  { %1047 = vst.msk [vmem:[#allocation2 + $0x38] sm:$0xff] %vm205_vm2, %v1044_v50  ;;  %1048 = vst.msk [vmem:[%s3266_s12] sm:$0xff] %vm205_vm2, %v1044_v50 }
0x1704   :  { %v1070_v51 = vld [vmem:[#allocation2 + $0x38] sm:$0xff] }
0x1705   :  { %2444 = vmatmul.mubr.msk.f32.gmra.mrb[20].mxu0 %vm205_vm2, %v1070_v51 }
0x1706   :  { %2476 = vmatprep.mubr.msk.f32.mxu0 %vm2788_vm1, %v2789_v4 }
0x1757   :  { %v1410_v56 = vpop.permute.xlu1 %1409 }
0x1758   :  { %v1412_v57 = vmul.f32 %v2732_v54, %v1410_v56 }
0x175a   :  { %1414 = vrot.lane.b32.xlu1 %v1412_v57, %s2791_s29 }
0x17cc   :  { %v1415_v60 = vpop.permute.xlu1 %1414 }
0x17cd   :  { %v1417_v61 = vadd.f32 %v1415_v60, %v1407_v59 }
0x17cf   :  { %2733 = vtanh.f32 %v1417_v61 }
0x17d8   :  { %v3153_v63 = vpop.f32.mrb[20].mxu0 }
0x17d9   :  { %v2734_v3 = vpop.eup %2733  ;;  %v3155_v5 = vpop.f32.mrb[21].mxu0 }
0x17da   :  { %1420 = vrot.lane.b32.xlu1 %v2734_v3, %s2790_s26 }
0x184c   :  { %v1421_v6 = vpop.permute.xlu1 %1420 }
0x184d   :  { %v1423_v7 = vmul.f32 %v2732_v54, %v1421_v6 }
0x184f   :  { %1425 = vrot.lane.b32.xlu1 %v1423_v7, %s2791_s29 }
0x18c1   :  { %v1426_v8 = vpop.permute.xlu1 %1425 }
0x18c2   :  { %1428 = vst.msk [vmem:[#allocation2 + $0x8] sm:$0xff] %vm205_vm2, %v1426_v8  ;;  %2477 = vmatmul.mubr.msk.f32.vlgmr.msra.gmra.mrb[22].mxu0 %vm205_vm2, %v1426_v8  ;;  %v1193_v8 = vadd.f32 %v3060_v42, %v3118_v10 }
0x18c3   :  { %2625 = vmatpush3.bf16.msra.mxu0 %v3075_v55  ;;  %2498 = vmatprep.mubr.msk.f32.mxu0 %vm2788_vm1, %v2789_v4 }
0x18c4   :  { %2626 = vmatprep.subr.bf16.mxu0 %v2787_v0 }
0x18c7   :  { %2628 = vmatpush3.bf16.msra.mxu0 %v3085_v58 }
0x18c8   :  { %2635 = vmatprep.subr.bf16.mxu0 %v2787_v0 }
0x1995   :  { %v1498_v11 = vpop.f32.mrb[22].mxu0 }
0x1996   :  { %v1502_v13 = vadd.f32 %v1498_v11, %v1178_v9  ;;  %v2478_v12 = vpop.f32.mrb[23].mxu0 }
0x1998   :  { %2735 = vtanh.f32 %v1502_v13  ;;  %v2202_v16 = vmul.f32 -1.442695, %v1502_v13 }
0x199a   :  { %2737 = vpow2.f32 %v2202_v16 }
0x19a2   :  { %v2736_v15 = vpop.eup %2735 }
0x19a3   :  { %1512 = vrot.lane.b32.xlu0 %v2736_v15, %s2790_s26 }
0x19a4   :  { %v2738_v62 = vpop.eup %2737 }
0x19a5   :  { %v1506_v14 = vadd.f32 1.0, %v2738_v62 }
0x19a7   :  { %2739 = vrcp.f32 %v1506_v14 }
0x19b1   :  { %v2740_v1 = vpop.eup %2739 }
0x19b2   :  { %v1510_v19 = vmul.f32 %v2740_v1, %v1417_v61 }
0x1a15   :  { %v1513_v17 = vpop.permute.xlu0 %1512 }
0x1a16   :  { %v1515_v18 = vmul.f32 %v2740_v1, %v1513_v17 }
0x1a18   :  { %1517 = vrot.lane.b32.xlu1 %v1515_v18, %s2791_s29 }
0x1a8a   :  { %v1518_v20 = vpop.permute.xlu1 %1517 }
0x1a8b   :  { %v1520_v41 = vadd.f32 %v1518_v20, %v1510_v19 }
0x1a8d   :  { %2741 = vtanh.f32 %v1520_v41 }
0x1a97   :  { %v2742_v21 = vpop.eup %2741 }
0x1a98   :  { %1523 = vrot.lane.b32.xlu0 %v2742_v21, %s2790_s26 }
0x1b0a   :  { %v1524_v22 = vpop.permute.xlu0 %1523 }
0x1b0b   :  { %v1526_v23 = vmul.f32 %v2740_v1, %v1524_v22 }
0x1b0d   :  { %1528 = vrot.lane.b32.xlu1 %v1526_v23, %s2791_s29 }
0x1b7f   :  { %v1529_v24 = vpop.permute.xlu1 %1528 }
0x1b80   :  { %1531 = vst.msk [vmem:[#allocation2 + $0x10] sm:$0xff] %vm205_vm2, %v1529_v24  ;;  %2488 = vmatmul.mubr.msk.f32.vlgmr.msra.gmra.mrb[14].mxu1 %vm205_vm2, %v1529_v24 }
0x1b81   :  { %2631 = vmatpush3.bf16.msra.mxu1 %v3075_v55  ;;  %2509 = vmatprep.mubr.msk.f32.mxu1 %vm2788_vm1, %v2789_v4 }
0x1b82   :  { %2632 = vmatprep.subr.bf16.mxu1 %v2787_v0 }
0x1b85   :  { %2634 = vmatpush3.bf16.msra.mxu1 %v3085_v58 }
0x1b86   :  { %2641 = vmatprep.subr.bf16.mxu1 %v2787_v0 }
0x1c53   :  { %v1601_v26 = vpop.f32.mrb[14].mxu1 }
0x1c54   :  { %v1605_v27 = vadd.f32 %v1601_v26, %v1183_v25  ;;  %v2489_v28 = vpop.f32.mrb[15].mxu1 }
0x1c56   :  { %2743 = vtanh.f32 %v1605_v27  ;;  %v2204_v30 = vmul.f32 -1.442695, %v1605_v27 }
0x1c58   :  { %2745 = vpow2.f32 %v2204_v30 }
0x1c60   :  { %v2744_v29 = vpop.eup %2743 }
0x1c61   :  { %1615 = vrot.lane.b32.xlu0 %v2744_v29, %s2790_s26 }
0x1c62   :  { %v2746_v31 = vpop.eup %2745 }
0x1c63   :  { %v1609_v32 = vadd.f32 1.0, %v2746_v31 }
0x1c65   :  { %2747 = vrcp.f32 %v1609_v32 }
0x1c6f   :  { %v2748_v33 = vpop.eup %2747 }
0x1c70   :  { %v1613_v36 = vmul.f32 %v2748_v33, %v1520_v41  ;;  %v1198_v41 = vadd.f32 %v3118_v10, %v3155_v5 }
0x1cd3   :  { %v1616_v34 = vpop.permute.xlu0 %1615 }
0x1cd4   :  { %v1618_v35 = vmul.f32 %v2748_v33, %v1616_v34 }
0x1cd6   :  { %1620 = vrot.lane.b32.xlu1 %v1618_v35, %s2791_s29 }
0x1d48   :  { %v1621_v40 = vpop.permute.xlu1 %1620 }
0x1d49   :  { %v1623_v39 = vadd.f32 %v1621_v40, %v1613_v36  ;;  %v1203_v36 = vadd.f32 %v3153_v63, %v3118_v10 }
0x1d4b   :  { %2749 = vtanh.f32 %v1623_v39 }
0x1d55   :  { %v2750_v44 = vpop.eup %2749 }
0x1d56   :  { %1626 = vrot.lane.b32.xlu0 %v2750_v44, %s2790_s26 }
0x1dc8   :  { %v1627_v2 = vpop.permute.xlu0 %1626 }
0x1dc9   :  { %v1629_v45 = vmul.f32 %v2748_v33, %v1627_v2 }
0x1dcb   :  { %1631 = vrot.lane.b32.xlu1 %v1629_v45, %s2791_s29 }
0x1e3d   :  { %v1632_v46 = vpop.permute.xlu1 %1631 }
0x1e3e   :  { %1634 = vst.msk [vmem:[#allocation2 + $0x18] sm:$0xff] %vm205_vm2, %v1632_v46  ;;  %2499 = vmatmul.mubr.msk.f32.vlgmr.msra.gmra.mrb[24].mxu0 %vm205_vm2, %v1632_v46 }
0x1e3f   :  { %2637 = vmatpush3.bf16.msra.mxu0 %v3075_v55  ;;  %2520 = vmatprep.mubr.msk.f32.mxu0 %vm2788_vm1, %v2789_v4 }
0x1e40   :  { %2638 = vmatprep.subr.bf16.mxu0 %v2787_v0 }
0x1e43   :  { %2640 = vmatpush3.bf16.msra.mxu0 %v3085_v58 }
0x1e44   :  { %2534 = vmatprep.subr.mxu0 %v2789_v4 }
0x1f11   :  { %v1704_v48 = vpop.f32.mrb[24].mxu0 }
0x1f12   :  { %v1708_v49 = vadd.f32 %v1704_v48, %v1188_v47  ;;  %v2500_v50 = vpop.f32.mrb[25].mxu0 }
0x1f14   :  { %2751 = vtanh.f32 %v1708_v49  ;;  %v2206_v37 = vmul.f32 -1.442695, %v1708_v49 }
0x1f16   :  { %2753 = vpow2.f32 %v2206_v37 }
0x1f1e   :  { %v2752_v51 = vpop.eup %2751 }
0x1f1f   :  { %1718 = vrot.lane.b32.xlu0 %v2752_v51, %s2790_s26 }
0x1f20   :  { %v2754_v52 = vpop.eup %2753 }
0x1f21   :  { %v1712_v53 = vadd.f32 1.0, %v2754_v52  ;;  %v2792_v52 = vmov 0  }
0x1f22   :  { %2654 = vset.pattern.permute.xlu0 %v2792_v52 }
0x1f23   :  { %2755 = vrcp.f32 %v1712_v53  ;;  %v19_v53 = vstv %s3267_s10 }
0x1f24   :  { %20 = vst [vmem:[#allocation4] sm:$0x1] %v19_v53 }
0x1f2d   :  { %v2756_v54 = vpop.eup %2755 }
0x1f2e   :  { %v1716_v59 = vmul.f32 %v2756_v54, %v1623_v39 }
0x1f91   :  { %v1719_v56 = vpop.permute.xlu0 %1718 }
0x1f92   :  { %v1721_v57 = vmul.f32 %v2756_v54, %v1719_v56 }
0x1f94   :  { %1723 = vrot.lane.b32.xlu1 %v1721_v57, %s2791_s29  ;;  %v2056_v57 = vld [vmem:[#allocation4] sm:$0x1] }
0x2006   :  { %v1724_v60 = vpop.permute.xlu1 %1723 }
0x2007   :  { %v1726_v43 = vadd.f32 %v1724_v60, %v1716_v59  ;;  %v2055_v60 = vld [vmem:[%s3268_s9] sm:$0x1] }
0x2009   :  { %2757 = vtanh.f32 %v1726_v43 }
0x2013   :  { %v2758_v61 = vpop.eup %2757 }
0x2014   :  { %1729 = vrot.lane.b32.xlu0 %v2758_v61, %s2790_s26  ;;  %v2062_v61 = vlaneseq }
0x2086   :  { %v1730_v3 = vpop.permute.xlu0 %1729 }
0x2087   :  { %v1732_v6 = vmul.f32 %v2756_v54, %v1730_v3  ;;  %v2063_v3 = vshrl.u32 %v2062_v61, 7 }
0x2089   :  { %1734 = vrot.lane.b32.xlu1 %v1732_v6, %s2791_s29  ;;  %v2064_v6 = vsub.s32 0, %v2063_v3 }
0x20fb   :  { %v1735_v7 = vpop.permute.xlu1 %1734 }
0x20fc   :  { %1737 = vst.msk [vmem:[#allocation2 + $0x20] sm:$0xff] %vm205_vm2, %v1735_v7  ;;  %2510 = vmatmul.mubr.msk.f32.vlgmr.msra.gmra.mrb[16].mxu1 %vm205_vm2, %v1735_v7 }
0x20fd   :  { %2643 = vmatpush3.bf16.msra.mxu1 %v3075_v55  ;;  %2531 = vmatprep.mubr.msk.f32.mxu1 %vm2788_vm1, %v2789_v4 }
0x20fe   :  { %2644 = vmatprep.subr.bf16.mxu1 %v2787_v0 }
0x2101   :  { %2646 = vmatpush3.bf16.msra.mxu1 %v3085_v58 }
0x21cf   :  { %v1807_v9 = vpop.f32.mrb[16].mxu1 }
0x21d0   :  { %v1811_v11 = vadd.f32 %v1807_v9, %v1193_v8  ;;  %v2511_v13 = vpop.f32.mrb[17].mxu1 }
0x21d2   :  { %2759 = vtanh.f32 %v1811_v11  ;;  %v2208_v15 = vmul.f32 -1.442695, %v1811_v11 }
0x21d4   :  { %2761 = vpow2.f32 %v2208_v15 }
0x21dc   :  { %v2760_v12 = vpop.eup %2759 }
0x21dd   :  { %1821 = vrot.lane.b32.xlu0 %v2760_v12, %s2790_s26 }
0x21de   :  { %v2762_v55 = vpop.eup %2761 }
0x21df   :  { %v1815_v16 = vadd.f32 1.0, %v2762_v55 }
0x21e1   :  { %2763 = vrcp.f32 %v1815_v16 }
0x21eb   :  { %v2764_v62 = vpop.eup %2763 }
0x21ec   :  { %v1819_v58 = vmul.f32 %v2764_v62, %v1726_v43 }
0x224f   :  { %v1822_v14 = vpop.permute.xlu0 %1821 }
0x2250   :  { %v1824_v0 = vmul.f32 %v2764_v62, %v1822_v14 }
0x2252   :  { %1826 = vrot.lane.b32.xlu1 %v1824_v0, %s2791_s29 }
0x22c4   :  { %v1827_v1 = vpop.permute.xlu1 %1826 }
0x22c5   :  { %v1829_v42 = vadd.f32 %v1827_v1, %v1819_v58 }
0x22c7   :  { %2765 = vtanh.f32 %v1829_v42 }
0x22d1   :  { %v2766_v17 = vpop.eup %2765 }
0x22d2   :  { %1832 = vrot.lane.b32.xlu0 %v2766_v17, %s2790_s26 }
0x2344   :  { %v1833_v18 = vpop.permute.xlu0 %1832 }
0x2345   :  { %v1835_v19 = vmul.f32 %v2764_v62, %v1833_v18 }
0x2347   :  { %1837 = vrot.lane.b32.xlu1 %v1835_v19, %s2791_s29 }
0x23b9   :  { %v1838_v20 = vpop.permute.xlu1 %1837 }
0x23ba   :  { %1840 = vst.msk [vmem:[#allocation2 + $0x28] sm:$0xff] %vm205_vm2, %v1838_v20  ;;  %2521 = vmatmul.mubr.msk.f32.vlgmr.msra.gmra.mrb[26].mxu0 %vm205_vm2, %v1838_v20 }
0x23bb   :  { %2536 = vmatprep.mubr.msk.f32.mxu0 %vm2788_vm1, %v2789_v4 }
0x248d   :  { %v1910_v21 = vpop.f32.mrb[26].mxu0 }
0x248e   :  { %v1914_v22 = vadd.f32 %v1910_v21, %v1198_v41  ;;  %v2522_v23 = vpop.f32.mrb[27].mxu0 }
0x2490   :  { %2767 = vtanh.f32 %v1914_v22  ;;  %v2210_v25 = vmul.f32 -1.442695, %v1914_v22 }
0x2492   :  { %2769 = vpow2.f32 %v2210_v25 }
0x249a   :  { %v2768_v24 = vpop.eup %2767 }
0x249b   :  { %1924 = vrot.lane.b32.xlu0 %v2768_v24, %s2790_s26 }
0x249c   :  { %v2770_v26 = vpop.eup %2769 }
0x249d   :  { %v1918_v27 = vadd.f32 1.0, %v2770_v26 }
0x249f   :  { %2771 = vrcp.f32 %v1918_v27 }
0x24a9   :  { %v2772_v28 = vpop.eup %2771 }
0x24aa   :  { %v1922_v4 = vmul.f32 %v2772_v28, %v1829_v42 }
0x250d   :  { %v1925_v29 = vpop.permute.xlu0 %1924 }
0x250e   :  { %v1927_v30 = vmul.f32 %v2772_v28, %v1925_v29 }
0x2510   :  { %1929 = vrot.lane.b32.xlu1 %v1927_v30, %s2791_s29 }
0x2582   :  { %v1930_v31 = vpop.permute.xlu1 %1929 }
0x2583   :  { %v1932_v5 = vadd.f32 %v1930_v31, %v1922_v4 }
0x2585   :  { %2773 = vtanh.f32 %v1932_v5 }
0x258f   :  { %v2774_v32 = vpop.eup %2773 }
0x2590   :  { %1935 = vrot.lane.b32.xlu0 %v2774_v32, %s2790_s26 }
0x2602   :  { %v1936_v33 = vpop.permute.xlu0 %1935 }
0x2603   :  { %v1938_v34 = vmul.f32 %v2772_v28, %v1936_v33 }
0x2605   :  { %1940 = vrot.lane.b32.xlu1 %v1938_v34, %s2791_s29 }
0x2677   :  { %v1941_v35 = vpop.permute.xlu1 %1940 }
0x2678   :  { %1943 = vst.msk [vmem:[#allocation2 + $0x30] sm:$0xff] %vm205_vm2, %v1941_v35  ;;  %2532 = vmatmul.mubr.msk.f32.vlgmr.msra.gmra.mrb[18].mxu1 %vm205_vm2, %v1941_v35 }
0x274b   :  { %v2013_v40 = vpop.f32.mrb[18].mxu1 }
0x274c   :  { %v2017_v39 = vadd.f32 %v2013_v40, %v1203_v36  ;;  %v2533_v44 = vpop.f32.mrb[19].mxu1 }
0x274e   :  { %2775 = vtanh.f32 %v2017_v39  ;;  %v2212_v45 = vmul.f32 -1.442695, %v2017_v39 }
0x2750   :  { %2777 = vpow2.f32 %v2212_v45 }
0x2758   :  { %v2776_v2 = vpop.eup %2775 }
0x2759   :  { %2027 = vrot.lane.b32.xlu0 %v2776_v2, %s2790_s26 }
0x275a   :  { %v2778_v46 = vpop.eup %2777 }
0x275b   :  { %v2021_v47 = vadd.f32 1.0, %v2778_v46 }
0x275d   :  { %2779 = vrcp.f32 %v2021_v47 }
0x2767   :  { %v2780_v48 = vpop.eup %2779 }
0x2768   :  { %v2025_v51 = vmul.f32 %v2780_v48, %v1932_v5 }
0x27cb   :  { %v2028_v49 = vpop.permute.xlu0 %2027 }
0x27cc   :  { %v2030_v50 = vmul.f32 %v2780_v48, %v2028_v49 }
0x27ce   :  { %2032 = vrot.lane.b32.xlu1 %v2030_v50, %s2791_s29 }
0x2840   :  { %v2033_v37 = vpop.permute.xlu1 %2032 }
0x2841   :  { %v2035_v10 = vadd.f32 %v2033_v37, %v2025_v51 }
0x2843   :  { %2781 = vtanh.f32 %v2035_v10 }
0x284d   :  { %v2782_v63 = vpop.eup %2781 }
0x284e   :  { %2038 = vrot.lane.b32.xlu0 %v2782_v63, %s2790_s26 }
0x2852   :  { %2059 = vperm.xlu0 %2654, %v2056_v57  }
0x28c0   :  { %v2039_v54 = vpop.permute.xlu0 %2038 }
0x28c1   :  { %v2041_v56 = vmul.f32 %v2780_v48, %v2039_v54 }
0x28c3   :  { %2043 = vrot.lane.b32.xlu1 %v2041_v56, %s2791_s29 }
0x28c7   :  { %1050 = vrot.lane.b32.xlu1 %v3134_v38, %s2793_s4 }
0x28cb   :  { %2050 = vrot.lane.b32.xlu1 %v2035_v10, %s2793_s4 }
0x28d1   :  { %v2060_v7 = vpop.permute.xlu0 %2059 }
0x28d2   :  { %v2065_v8 = vrot.slane %v2060_v7, %v2064_v6 }
0x2935   :  { %v2044_v59 = vpop.permute.xlu1 %2043 }
0x2936   :  { %2046 = vst.msk [vmem:[#allocation2 + $0x38] sm:$0xff] %vm205_vm2, %v2044_v59  ;;  %2213 = vst.msk [vmem:[%s3266_s12 + $0x8] sm:$0xff] %vm205_vm2, %v2044_v59  ;;  %2535 = vmatpush3.xpose.msk.msra.mxu0 %vm205_vm2, %v2044_v59 }
0x2939   :  { %2537 = vmatmul.mubr.msk.f32.vlgmr.msra.gmra.mrb[28].mxu0 %vm205_vm2, %v2055_v60  ;;  %v1051_v38 = vpop.permute.xlu1 %1050 }
0x293a   :  { %1053 = vst.msk [vmem:[%s3269_s13] sm:$0xff] %vm205_vm2, %v1051_v38 }
0x293d   :  { %v2051_v43 = vpop.permute.xlu1 %2050 }
0x293e   :  { %2214 = vst.msk [vmem:[%s3269_s13 + $0x8] sm:$0xff] %vm205_vm2, %v2051_v43 }
0x2a0c   :  { %v2137_v9 = vpop.f32.mrb[28].mxu0 }
0x2a0d   :  { %v2138_v11 = vadd.f32 %v2137_v9, %v2065_v8  ;;  %v2538_v13 = vpop.f32.mrb[29].mxu0 }
0x2a0f   :  { %v2217_v12 = vmul.f32 -1.442695, %v2138_v11 }
0x2a11   :  { %2783 = vpow2.f32 %v2217_v12 }
0x2a1b   :  { %v2784_v15 = vpop.eup %2783 }
0x2a1c   :  { %v2144_v55 = vadd.f32 1.0, %v2784_v15 }
0x2a1e   :  { %2785 = vrcp.f32 %v2144_v55 }
0x2a28   :  { %v2786_v16 = vpop.eup %2785 }
0x2a29   :  { %2148 = vst.msk [vmem:[%s3270_s11] sm:$0x1] %vm2147_vm3, %v2786_v16 }

</bundles_post_ra>
